<compile_context>
chip_gen: v7x
topology: tpu7x:2x2x1
jax: 0.10.0
libtpu: 0.0.40
codegen_flags: <defaults>
</compile_context>

<pallas_src>
import jax
import jax.numpy as jnp
import numpy as np
from jax.experimental import pallas as pl
from jax.experimental.pallas import tpu as pltpu


# -----------------------------------------------------------------------------
# Pallas kernel: input projection + both recurrences + final FC, one invocation.
#
#   emb_ref : (T, B, E)    embedded sequence.
#   wif/wib : (E, 4*HP)    per-direction input weights, gate order [i f o g],
#                          each gate padded to HP (=128k) lanes (pad cols zero).
#   whf/whb : (HP, 4*HP)   per-direction recurrent weights (rows H..HP zero).
#   bf/bb   : (1, 4*HP)    fused b_ih + b_hh per direction (padded).
#   fcwf/fcwb: (HP, O)     fc weight halves (pre-transposed, rows H..HP zero).
#   fcb     : (1, O)       fc bias.
#   o_ref   : (B, O)       fc(output[-1]).
#   gxf/gxb : (T, B, 4*HP) VMEM scratch for per-time gate pre-activations.
# -----------------------------------------------------------------------------
def _bilstm_fc_kernel(emb_ref, wif_ref, wib_ref, whf_ref, whb_ref,
                      bf_ref, bb_ref, fcwf_ref, fcwb_ref, fcb_ref,
                      o_ref, gxf_ref, gxb_ref):
    T, B, _ = emb_ref.shape
    G = gxf_ref.shape[2]          # 4 * HP
    HP = G // 4

    # Hoist constant weight loads / bias broadcasts out of all loops.
    wif = wif_ref[...]
    wib = wib_ref[...]
    whf = whf_ref[...]
    whb = whb_ref[...]
    bf = jnp.broadcast_to(bf_ref[...], (B, G))
    bb = jnp.broadcast_to(bb_ref[...], (B, G))

    # ---- Prologue: time-parallel input projection for BOTH directions into VMEM
    # scratch.  gx never touches HBM.
    def proj(t, carry):
        xt = emb_ref[t]                                                    # (B, E)
        gxf_ref[t] = jnp.dot(xt, wif, preferred_element_type=jnp.float32) + bf
        gxb_ref[t] = jnp.dot(xt, wib, preferred_element_type=jnp.float32) + bb
        return carry

    jax.lax.fori_loop(0, T, proj, 0, unroll=min(T, 8))

    # ---- LSTM cell on lane-aligned gate slabs [i | f | o | g], each HP lanes wide.
    def cell(gates, c):
        s = jax.nn.sigmoid(gates[:, :3 * HP])   # i,f,o: one contiguous 3*HP slab
        g = jnp.tanh(gates[:, 3 * HP:])
        c_new = s[:, HP:2 * HP] * c + s[:, :HP] * g
        h_new = s[:, 2 * HP:3 * HP] * jnp.tanh(c_new)
        return h_new, c_new

    # ---- Peeled step 0 (h = c = 0  =>  recurrent matmul contributes nothing).
    zero = jnp.zeros((B, HP), jnp.float32)
    hf, cf = cell(gxf_ref[0], zero)           # forward dir, sequence position 0
    hb, cb = cell(gxb_ref[T - 1], zero)       # backward dir, sequence position T-1
    hb_last = hb  # backward half of output[-1] == backward state at position T-1

    # ---- Remaining T-1 steps: two independent small matmuls per step (no concat,
    # no block-diagonal zero halves).
    def step(s, carry):
        hf, cf, hb, cb = carry
        gf = gxf_ref[s] + jnp.dot(hf, whf, preferred_element_type=jnp.float32)
        gb = gxb_ref[T - 1 - s] + jnp.dot(hb, whb,
                                          preferred_element_type=jnp.float32)
        hf, cf = cell(gf, cf)
        hb, cb = cell(gb, cb)
        return hf, cf, hb, cb

    hf, cf, hb, cb = jax.lax.fori_loop(1, T, step, (hf, cf, hb, cb),
                                       unroll=max(1, min(T - 1, 8)))

    # ---- Fused final Linear on output[-1] = [hf(T-1) | hb(at position T-1)],
    # written as two matmuls so no concat is needed.  Padded h lanes are zero and
    # the matching fc rows are zero, so padding never leaks into the output.
    o_ref[...] = (jnp.dot(hf, fcwf_ref[...], preferred_element_type=jnp.float32)
                  + jnp.dot(hb_last, fcwb_ref[...],
                            preferred_element_type=jnp.float32)
                  + fcb_ref[...])


def bilstm_fc_pallas(emb, wif, wib, whf, whb, bf, bb, fcwf, fcwb, fcb):
    T, B, _ = emb.shape
    G = wif.shape[1]
    O = fcwf.shape[1]
    vmem_spec = pl.BlockSpec(memory_space=pltpu.MemorySpace.VMEM)
    return pl.pallas_call(
        _bilstm_fc_kernel,
        out_shape=jax.ShapeDtypeStruct((B, O), jnp.float32),
        in_specs=[vmem_spec] * 10,
        out_specs=vmem_spec,
        scratch_shapes=[
            pltpu.VMEM((T, B, G), jnp.float32),   # forward-direction gate pre-acts
            pltpu.VMEM((T, B, G), jnp.float32),   # backward-direction gate pre-acts
        ],
        # TODO(synk): for large T switch to a T-chunked grid (streamed gate chunks,
        # h/c carried in scratch) and re-size vmem_limit for v7x's 64 MiB VMEM.
        compiler_params=pltpu.CompilerParams(vmem_limit_bytes=32 * 1024 * 1024),
    )(emb, wif, wib, whf, whb, bf, bb, fcwf, fcwb, fcb)


# -----------------------------------------------------------------------------
# One-time weight plumbing (NOT in the hot path): PyTorch gate order [i,f,g,o] ->
# [i,f,o,g], pad each gate block to 128 lanes, fuse biases, split/transpose fc.
# -----------------------------------------------------------------------------
def _pad_last(x, hp):
    h = x.shape[-1]
    if h == hp:
        return x
    return jnp.pad(x, [(0, 0)] * (x.ndim - 1) + [(0, hp - h)])


def prepare_bilstm_params(params):
    H = params["w_hh_f"].shape[1]
    HP = -(-H // 128) * 128                      # pad each gate block to 128 lanes

    def prep_wi(w):                              # (4H, E) -> (E, 4*HP)
        i, f, g, o = jnp.split(w, 4, axis=0)
        return jnp.concatenate([_pad_last(b.T, HP) for b in (i, f, o, g)], axis=1)

    def prep_wh(w):                              # (4H, H) -> (HP, 4*HP)
        i, f, g, o = jnp.split(w, 4, axis=0)
        wt = jnp.concatenate([_pad_last(b.T, HP) for b in (i, f, o, g)], axis=1)
        return jnp.pad(wt, ((0, HP - H), (0, 0)))

    def prep_bias(b_ih, b_hh):                   # (4H,) -> (1, 4*HP)
        i, f, g, o = jnp.split(b_ih + b_hh, 4)
        return jnp.concatenate([_pad_last(b, HP) for b in (i, f, o, g)])[None, :]

    fc_w, fc_b = params["fc_w"], params["fc_b"]
    fcwf = jnp.pad(fc_w[:, :H].T, ((0, HP - H), (0, 0)))    # (HP, O)
    fcwb = jnp.pad(fc_w[:, H:].T, ((0, HP - H), (0, 0)))    # (HP, O)

    return {
        "embedding": params["embedding"],
        "wif": prep_wi(params["w_ih_f"]), "wib": prep_wi(params["w_ih_b"]),
        "whf": prep_wh(params["w_hh_f"]), "whb": prep_wh(params["w_hh_b"]),
        "bf": prep_bias(params["b_ih_f"], params["b_hh_f"]),
        "bb": prep_bias(params["b_ih_b"], params["b_hh_b"]),
        "fcwf": fcwf, "fcwb": fcwb, "fcb": fc_b[None, :],
    }


def bilstm_dropout_forward(text, kp):
    # TODO(synk): embedding row gather stays in XLA glue; an in-kernel dynamic gather
    # (scalar-prefetched ids + jnp.take on a VMEM table) is not worth the lowering
    # risk at these sizes.
    embedded = kp["embedding"][text]                                   # (T, B, E)
    return bilstm_fc_pallas(embedded, kp["wif"], kp["wib"], kp["whf"], kp["whb"],
                            kp["bf"], kp["bb"], kp["fcwf"], kp["fcwb"], kp["fcb"])


# -----------------------------------------------------------------------------
# Pure-JAX reference (correctness check) — PyTorch gate order i, f, g, o.
# -----------------------------------------------------------------------------
def reference_forward(text, params):
    embedded = params["embedding"][text]                               # (T, B, E)
    H = params["w_hh_f"].shape[1]

    def make_step(wi, wh, bi, bh):
        def step(carry, x):
            h, c = carry
            g = x @ wi.T + h @ wh.T + bi + bh
            i = jax.nn.sigmoid(g[:, 0 * H:1 * H])
            f = jax.nn.sigmoid(g[:, 1 * H:2 * H])
            gg = jnp.tanh(g[:, 2 * H:3 * H])
            o = jax.nn.sigmoid(g[:, 3 * H:4 * H])
            c = f * c + i * gg
            h = o * jnp.tanh(c)
            return (h, c), h
        return step

    B = embedded.shape[1]
    init = (jnp.zeros((B, H), jnp.float32), jnp.zeros((B, H), jnp.float32))
    _, hf = jax.lax.scan(make_step(params["w_ih_f"], params["w_hh_f"],
                                   params["b_ih_f"], params["b_hh_f"]),
                         init, embedded)
    _, hb = jax.lax.scan(make_step(params["w_ih_b"], params["w_hh_b"],
                                   params["b_ih_b"], params["b_hh_b"]),
                         init, embedded[::-1])
    hb = hb[::-1]
    last = jnp.concatenate([hf[-1], hb[-1]], axis=-1)
    return last @ params["fc_w"].T + params["fc_b"]


if __name__ == "__main__":
    INPUT_DIM = 50      # vocab size
    EMB_DIM = 32
    HIDDEN_DIM = 32
    OUTPUT_DIM = 8
    SEQ_LEN = 8
    BATCH = 2

    key = jax.random.PRNGKey(0)
    ks = jax.random.split(key, 12)

    def init(k, shape, scale=0.1):
        return (scale * jax.random.normal(k, shape)).astype(jnp.float32)

    params = {
        "embedding": init(ks[0], (INPUT_DIM, EMB_DIM)),
        # forward direction (PyTorch layout: weight_ih (4H, E), weight_hh (4H, H))
        "w_ih_f": init(ks[1], (4 * HIDDEN_DIM, EMB_DIM)),
        "w_hh_f": init(ks[2], (4 * HIDDEN_DIM, HIDDEN_DIM)),
        "b_ih_f": init(ks[3], (4 * HIDDEN_DIM,)),
        "b_hh_f": init(ks[4], (4 * HIDDEN_DIM,)),
        # backward direction
        "w_ih_b": init(ks[5], (4 * HIDDEN_DIM, EMB_DIM)),
        "w_hh_b": init(ks[6], (4 * HIDDEN_DIM, HIDDEN_DIM)),
        "b_ih_b": init(ks[7], (4 * HIDDEN_DIM,)),
        "b_hh_b": init(ks[8], (4 * HIDDEN_DIM,)),
        # fc
        "fc_w": init(ks[9], (OUTPUT_DIM, 2 * HIDDEN_DIM)),
        "fc_b": init(ks[10], (OUTPUT_DIM,)),
    }

    text = jax.random.randint(ks[11], (SEQ_LEN, BATCH), 0, INPUT_DIM,
                              dtype=jnp.int32)

    # Weight plumbing done once, outside the jitted forward.
    kparams = prepare_bilstm_params(params)

    fwd = jax.jit(bilstm_dropout_forward)
    out = jax.block_until_ready(fwd(text, kparams))

    ref = jax.block_until_ready(reference_forward(text, params))
    np.testing.assert_allclose(np.asarray(out), np.asarray(ref),
                               rtol=1e-5, atol=2e-5)
    assert out.shape == (BATCH, OUTPUT_DIM)
    print("KERNEL_OK")
</pallas_src>

<mosaic_0001>
module attributes {stable_mosaic.version = 11 : i64} {
  func.func @_bilstm_fc_kernel(%arg0: memref<8x2x32xf32, #tpu.memory_space<vmem>>, %arg1: memref<32x512xf32, #tpu.memory_space<vmem>>, %arg2: memref<32x512xf32, #tpu.memory_space<vmem>>, %arg3: memref<128x512xf32, #tpu.memory_space<vmem>>, %arg4: memref<128x512xf32, #tpu.memory_space<vmem>>, %arg5: memref<1x512xf32, #tpu.memory_space<vmem>>, %arg6: memref<1x512xf32, #tpu.memory_space<vmem>>, %arg7: memref<128x8xf32, #tpu.memory_space<vmem>>, %arg8: memref<128x8xf32, #tpu.memory_space<vmem>>, %arg9: memref<1x8xf32, #tpu.memory_space<vmem>>, %arg10: memref<2x8xf32, #tpu.memory_space<vmem>>, %arg11: memref<8x2x512xf32, #tpu.memory_space<vmem>>, %arg12: memref<8x2x512xf32, #tpu.memory_space<vmem>>) attributes {dimension_semantics = [], scalar_prefetch = 0 : i64, scratch_operands = 2 : i64, tpu.core_type = #tpu.core_type<tc>} {
    %c0 = arith.constant 0 : index
    %c0_0 = arith.constant 0 : index
    %0 = vector.load %arg1[%c0, %c0_0] : memref<32x512xf32, #tpu.memory_space<vmem>>, vector<32x512xf32>
    %c0_1 = arith.constant 0 : index
    %c0_2 = arith.constant 0 : index
    %1 = vector.load %arg2[%c0_1, %c0_2] : memref<32x512xf32, #tpu.memory_space<vmem>>, vector<32x512xf32>
    %c0_3 = arith.constant 0 : index
    %c0_4 = arith.constant 0 : index
    %2 = vector.load %arg3[%c0_3, %c0_4] : memref<128x512xf32, #tpu.memory_space<vmem>>, vector<128x512xf32>
    %c0_5 = arith.constant 0 : index
    %c0_6 = arith.constant 0 : index
    %3 = vector.load %arg5[%c0_5, %c0_6] : memref<1x512xf32, #tpu.memory_space<vmem>>, vector<1x512xf32>
    %4 = vector.shape_cast %3 : vector<1x512xf32> to vector<1x512xf32>
    %5 = vector.broadcast %4 : vector<1x512xf32> to vector<2x512xf32>
    %c0_7 = arith.constant 0 : index
    %c0_8 = arith.constant 0 : index
    %6 = vector.load %arg6[%c0_7, %c0_8] : memref<1x512xf32, #tpu.memory_space<vmem>>, vector<1x512xf32>
    %7 = vector.shape_cast %6 : vector<1x512xf32> to vector<1x512xf32>
    %8 = vector.broadcast %7 : vector<1x512xf32> to vector<2x512xf32>
    %c0_i32 = arith.constant 0 : i32
    %9 = arith.index_cast %c0_i32 : i32 to index
    %c0_9 = arith.constant 0 : index
    %c0_10 = arith.constant 0 : index
    %10 = vector.load %arg0[%9, %c0_9, %c0_10] : memref<8x2x32xf32, #tpu.memory_space<vmem>>, vector<1x2x32xf32>
    %11 = vector.shape_cast %10 : vector<1x2x32xf32> to vector<2x32xf32>
    %cst = arith.constant dense<0.000000e+00> : vector<2x512xf32>
    %12 = tpu.matmul %11, %0, %cst {dimension_numbers = #tpu.dot_dimension_numbers<[1], [0], [0], [1], [0, 0, 1, 1], [], []>} : vector<2x32xf32>, vector<32x512xf32>, vector<2x512xf32> -> vector<2x512xf32>
    %13 = arith.addf %12, %5 : vector<2x512xf32>
    %14 = arith.index_cast %c0_i32 : i32 to index
    %c0_11 = arith.constant 0 : index
    %c0_12 = arith.constant 0 : index
    %15 = vector.load %arg11[%14, %c0_11, %c0_12] : memref<8x2x512xf32, #tpu.memory_space<vmem>>, vector<1x2x512xf32>
    %16 = vector.shape_cast %15 : vector<1x2x512xf32> to vector<2x512xf32>
    %17 = vector.shape_cast %13 : vector<2x512xf32> to vector<1x2x512xf32>
    tpu.vector_store %arg11[%14, %c0_11, %c0_12], %17 {strides = array<i32>} : memref<8x2x512xf32, #tpu.memory_space<vmem>>, vector<1x2x512xf32>,
    %cst_13 = arith.constant dense<0.000000e+00> : vector<2x512xf32>
    %18 = tpu.matmul %11, %1, %cst_13 {dimension_numbers = #tpu.dot_dimension_numbers<[1], [0], [0], [1], [0, 0, 1, 1], [], []>} : vector<2x32xf32>, vector<32x512xf32>, vector<2x512xf32> -> vector<2x512xf32>
    %19 = arith.addf %18, %8 : vector<2x512xf32>
    %20 = arith.index_cast %c0_i32 : i32 to index
    %c0_14 = arith.constant 0 : index
    %c0_15 = arith.constant 0 : index
    %21 = vector.load %arg12[%20, %c0_14, %c0_15] : memref<8x2x512xf32, #tpu.memory_space<vmem>>, vector<1x2x512xf32>
    %22 = vector.shape_cast %21 : vector<1x2x512xf32> to vector<2x512xf32>
    %23 = vector.shape_cast %19 : vector<2x512xf32> to vector<1x2x512xf32>
    tpu.vector_store %arg12[%20, %c0_14, %c0_15], %23 {strides = array<i32>} : memref<8x2x512xf32, #tpu.memory_space<vmem>>, vector<1x2x512xf32>,
    %c1_i32 = arith.constant 1 : i32
    %24 = arith.index_cast %c1_i32 : i32 to index
    %c0_16 = arith.constant 0 : index
    %c0_17 = arith.constant 0 : index
    %25 = vector.load %arg0[%24, %c0_16, %c0_17] : memref<8x2x32xf32, #tpu.memory_space<vmem>>, vector<1x2x32xf32>
    %26 = vector.shape_cast %25 : vector<1x2x32xf32> to vector<2x32xf32>
    %cst_18 = arith.constant dense<0.000000e+00> : vector<2x512xf32>
    %27 = tpu.matmul %26, %0, %cst_18 {dimension_numbers = #tpu.dot_dimension_numbers<[1], [0], [0], [1], [0, 0, 1, 1], [], []>} : vector<2x32xf32>, vector<32x512xf32>, vector<2x512xf32> -> vector<2x512xf32>
    %28 = arith.addf %27, %5 : vector<2x512xf32>
    %29 = arith.index_cast %c1_i32 : i32 to index
    %c0_19 = arith.constant 0 : index
    %c0_20 = arith.constant 0 : index
    %30 = vector.load %arg11[%29, %c0_19, %c0_20] : memref<8x2x512xf32, #tpu.memory_space<vmem>>, vector<1x2x512xf32>
    %31 = vector.shape_cast %30 : vector<1x2x512xf32> to vector<2x512xf32>
    %32 = vector.shape_cast %28 : vector<2x512xf32> to vector<1x2x512xf32>
    tpu.vector_store %arg11[%29, %c0_19, %c0_20], %32 {strides = array<i32>} : memref<8x2x512xf32, #tpu.memory_space<vmem>>, vector<1x2x512xf32>,
    %cst_21 = arith.constant dense<0.000000e+00> : vector<2x512xf32>
    %33 = tpu.matmul %26, %1, %cst_21 {dimension_numbers = #tpu.dot_dimension_numbers<[1], [0], [0], [1], [0, 0, 1, 1], [], []>} : vector<2x32xf32>, vector<32x512xf32>, vector<2x512xf32> -> vector<2x512xf32>
    %34 = arith.addf %33, %8 : vector<2x512xf32>
    %35 = arith.index_cast %c1_i32 : i32 to index
    %c0_22 = arith.constant 0 : index
    %c0_23 = arith.constant 0 : index
    %36 = vector.load %arg12[%35, %c0_22, %c0_23] : memref<8x2x512xf32, #tpu.memory_space<vmem>>, vector<1x2x512xf32>
    %37 = vector.shape_cast %36 : vector<1x2x512xf32> to vector<2x512xf32>
    %38 = vector.shape_cast %34 : vector<2x512xf32> to vector<1x2x512xf32>
    tpu.vector_store %arg12[%35, %c0_22, %c0_23], %38 {strides = array<i32>} : memref<8x2x512xf32, #tpu.memory_space<vmem>>, vector<1x2x512xf32>,
    %c2_i32 = arith.constant 2 : i32
    %39 = arith.index_cast %c2_i32 : i32 to index
    %c0_24 = arith.constant 0 : index
    %c0_25 = arith.constant 0 : index
    %40 = vector.load %arg0[%39, %c0_24, %c0_25] : memref<8x2x32xf32, #tpu.memory_space<vmem>>, vector<1x2x32xf32>
    %41 = vector.shape_cast %40 : vector<1x2x32xf32> to vector<2x32xf32>
    %cst_26 = arith.constant dense<0.000000e+00> : vector<2x512xf32>
    %42 = tpu.matmul %41, %0, %cst_26 {dimension_numbers = #tpu.dot_dimension_numbers<[1], [0], [0], [1], [0, 0, 1, 1], [], []>} : vector<2x32xf32>, vector<32x512xf32>, vector<2x512xf32> -> vector<2x512xf32>
    %43 = arith.addf %42, %5 : vector<2x512xf32>
    %44 = arith.index_cast %c2_i32 : i32 to index
    %c0_27 = arith.constant 0 : index
    %c0_28 = arith.constant 0 : index
    %45 = vector.load %arg11[%44, %c0_27, %c0_28] : memref<8x2x512xf32, #tpu.memory_space<vmem>>, vector<1x2x512xf32>
    %46 = vector.shape_cast %45 : vector<1x2x512xf32> to vector<2x512xf32>
    %47 = vector.shape_cast %43 : vector<2x512xf32> to vector<1x2x512xf32>
    tpu.vector_store %arg11[%44, %c0_27, %c0_28], %47 {strides = array<i32>} : memref<8x2x512xf32, #tpu.memory_space<vmem>>, vector<1x2x512xf32>,
    %cst_29 = arith.constant dense<0.000000e+00> : vector<2x512xf32>
    %48 = tpu.matmul %41, %1, %cst_29 {dimension_numbers = #tpu.dot_dimension_numbers<[1], [0], [0], [1], [0, 0, 1, 1], [], []>} : vector<2x32xf32>, vector<32x512xf32>, vector<2x512xf32> -> vector<2x512xf32>
    %49 = arith.addf %48, %8 : vector<2x512xf32>
    %50 = arith.index_cast %c2_i32 : i32 to index
    %c0_30 = arith.constant 0 : index
    %c0_31 = arith.constant 0 : index
    %51 = vector.load %arg12[%50, %c0_30, %c0_31] : memref<8x2x512xf32, #tpu.memory_space<vmem>>, vector<1x2x512xf32>
    %52 = vector.shape_cast %51 : vector<1x2x512xf32> to vector<2x512xf32>
    %53 = vector.shape_cast %49 : vector<2x512xf32> to vector<1x2x512xf32>
    tpu.vector_store %arg12[%50, %c0_30, %c0_31], %53 {strides = array<i32>} : memref<8x2x512xf32, #tpu.memory_space<vmem>>, vector<1x2x512xf32>,
    %c3_i32 = arith.constant 3 : i32
    %54 = arith.index_cast %c3_i32 : i32 to index
    %c0_32 = arith.constant 0 : index
    %c0_33 = arith.constant 0 : index
    %55 = vector.load %arg0[%54, %c0_32, %c0_33] : memref<8x2x32xf32, #tpu.memory_space<vmem>>, vector<1x2x32xf32>
    %56 = vector.shape_cast %55 : vector<1x2x32xf32> to vector<2x32xf32>
    %cst_34 = arith.constant dense<0.000000e+00> : vector<2x512xf32>
    %57 = tpu.matmul %56, %0, %cst_34 {dimension_numbers = #tpu.dot_dimension_numbers<[1], [0], [0], [1], [0, 0, 1, 1], [], []>} : vector<2x32xf32>, vector<32x512xf32>, vector<2x512xf32> -> vector<2x512xf32>
    %58 = arith.addf %57, %5 : vector<2x512xf32>
    %59 = arith.index_cast %c3_i32 : i32 to index
    %c0_35 = arith.constant 0 : index
    %c0_36 = arith.constant 0 : index
    %60 = vector.load %arg11[%59, %c0_35, %c0_36] : memref<8x2x512xf32, #tpu.memory_space<vmem>>, vector<1x2x512xf32>
    %61 = vector.shape_cast %60 : vector<1x2x512xf32> to vector<2x512xf32>
    %62 = vector.shape_cast %58 : vector<2x512xf32> to vector<1x2x512xf32>
    tpu.vector_store %arg11[%59, %c0_35, %c0_36], %62 {strides = array<i32>} : memref<8x2x512xf32, #tpu.memory_space<vmem>>, vector<1x2x512xf32>,
    %cst_37 = arith.constant dense<0.000000e+00> : vector<2x512xf32>
    %63 = tpu.matmul %56, %1, %cst_37 {dimension_numbers = #tpu.dot_dimension_numbers<[1], [0], [0], [1], [0, 0, 1, 1], [], []>} : vector<2x32xf32>, vector<32x512xf32>, vector<2x512xf32> -> vector<2x512xf32>
    %64 = arith.addf %63, %8 : vector<2x512xf32>
    %65 = arith.index_cast %c3_i32 : i32 to index
    %c0_38 = arith.constant 0 : index
    %c0_39 = arith.constant 0 : index
    %66 = vector.load %arg12[%65, %c0_38, %c0_39] : memref<8x2x512xf32, #tpu.memory_space<vmem>>, vector<1x2x512xf32>
    %67 = vector.shape_cast %66 : vector<1x2x512xf32> to vector<2x512xf32>
    %68 = vector.shape_cast %64 : vector<2x512xf32> to vector<1x2x512xf32>
    tpu.vector_store %arg12[%65, %c0_38, %c0_39], %68 {strides = array<i32>} : memref<8x2x512xf32, #tpu.memory_space<vmem>>, vector<1x2x512xf32>,
    %c4_i32 = arith.constant 4 : i32
    %69 = arith.index_cast %c4_i32 : i32 to index
    %c0_40 = arith.constant 0 : index
    %c0_41 = arith.constant 0 : index
    %70 = vector.load %arg0[%69, %c0_40, %c0_41] : memref<8x2x32xf32, #tpu.memory_space<vmem>>, vector<1x2x32xf32>
    %71 = vector.shape_cast %70 : vector<1x2x32xf32> to vector<2x32xf32>
    %cst_42 = arith.constant dense<0.000000e+00> : vector<2x512xf32>
    %72 = tpu.matmul %71, %0, %cst_42 {dimension_numbers = #tpu.dot_dimension_numbers<[1], [0], [0], [1], [0, 0, 1, 1], [], []>} : vector<2x32xf32>, vector<32x512xf32>, vector<2x512xf32> -> vector<2x512xf32>
    %73 = arith.addf %72, %5 : vector<2x512xf32>
    %74 = arith.index_cast %c4_i32 : i32 to index
    %c0_43 = arith.constant 0 : index
    %c0_44 = arith.constant 0 : index
    %75 = vector.load %arg11[%74, %c0_43, %c0_44] : memref<8x2x512xf32, #tpu.memory_space<vmem>>, vector<1x2x512xf32>
    %76 = vector.shape_cast %75 : vector<1x2x512xf32> to vector<2x512xf32>
    %77 = vector.shape_cast %73 : vector<2x512xf32> to vector<1x2x512xf32>
    tpu.vector_store %arg11[%74, %c0_43, %c0_44], %77 {strides = array<i32>} : memref<8x2x512xf32, #tpu.memory_space<vmem>>, vector<1x2x512xf32>,
    %cst_45 = arith.constant dense<0.000000e+00> : vector<2x512xf32>
    %78 = tpu.matmul %71, %1, %cst_45 {dimension_numbers = #tpu.dot_dimension_numbers<[1], [0], [0], [1], [0, 0, 1, 1], [], []>} : vector<2x32xf32>, vector<32x512xf32>, vector<2x512xf32> -> vector<2x512xf32>
    %79 = arith.addf %78, %8 : vector<2x512xf32>
    %80 = arith.index_cast %c4_i32 : i32 to index
    %c0_46 = arith.constant 0 : index
    %c0_47 = arith.constant 0 : index
    %81 = vector.load %arg12[%80, %c0_46, %c0_47] : memref<8x2x512xf32, #tpu.memory_space<vmem>>, vector<1x2x512xf32>
    %82 = vector.shape_cast %81 : vector<1x2x512xf32> to vector<2x512xf32>
    %83 = vector.shape_cast %79 : vector<2x512xf32> to vector<1x2x512xf32>
    tpu.vector_store %arg12[%80, %c0_46, %c0_47], %83 {strides = array<i32>} : memref<8x2x512xf32, #tpu.memory_space<vmem>>, vector<1x2x512xf32>,
    %c5_i32 = arith.constant 5 : i32
    %84 = arith.index_cast %c5_i32 : i32 to index
    %c0_48 = arith.constant 0 : index
    %c0_49 = arith.constant 0 : index
    %85 = vector.load %arg0[%84, %c0_48, %c0_49] : memref<8x2x32xf32, #tpu.memory_space<vmem>>, vector<1x2x32xf32>
    %86 = vector.shape_cast %85 : vector<1x2x32xf32> to vector<2x32xf32>
    %cst_50 = arith.constant dense<0.000000e+00> : vector<2x512xf32>
    %87 = tpu.matmul %86, %0, %cst_50 {dimension_numbers = #tpu.dot_dimension_numbers<[1], [0], [0], [1], [0, 0, 1, 1], [], []>} : vector<2x32xf32>, vector<32x512xf32>, vector<2x512xf32> -> vector<2x512xf32>
    %88 = arith.addf %87, %5 : vector<2x512xf32>
    %89 = arith.index_cast %c5_i32 : i32 to index
    %c0_51 = arith.constant 0 : index
    %c0_52 = arith.constant 0 : index
    %90 = vector.load %arg11[%89, %c0_51, %c0_52] : memref<8x2x512xf32, #tpu.memory_space<vmem>>, vector<1x2x512xf32>
    %91 = vector.shape_cast %90 : vector<1x2x512xf32> to vector<2x512xf32>
    %92 = vector.shape_cast %88 : vector<2x512xf32> to vector<1x2x512xf32>
    tpu.vector_store %arg11[%89, %c0_51, %c0_52], %92 {strides = array<i32>} : memref<8x2x512xf32, #tpu.memory_space<vmem>>, vector<1x2x512xf32>,
    %cst_53 = arith.constant dense<0.000000e+00> : vector<2x512xf32>
    %93 = tpu.matmul %86, %1, %cst_53 {dimension_numbers = #tpu.dot_dimension_numbers<[1], [0], [0], [1], [0, 0, 1, 1], [], []>} : vector<2x32xf32>, vector<32x512xf32>, vector<2x512xf32> -> vector<2x512xf32>
    %94 = arith.addf %93, %8 : vector<2x512xf32>
    %95 = arith.index_cast %c5_i32 : i32 to index
    %c0_54 = arith.constant 0 : index
    %c0_55 = arith.constant 0 : index
    %96 = vector.load %arg12[%95, %c0_54, %c0_55] : memref<8x2x512xf32, #tpu.memory_space<vmem>>, vector<1x2x512xf32>
    %97 = vector.shape_cast %96 : vector<1x2x512xf32> to vector<2x512xf32>
    %98 = vector.shape_cast %94 : vector<2x512xf32> to vector<1x2x512xf32>
    tpu.vector_store %arg12[%95, %c0_54, %c0_55], %98 {strides = array<i32>} : memref<8x2x512xf32, #tpu.memory_space<vmem>>, vector<1x2x512xf32>,
    %c6_i32 = arith.constant 6 : i32
    %99 = arith.index_cast %c6_i32 : i32 to index
    %c0_56 = arith.constant 0 : index
    %c0_57 = arith.constant 0 : index
    %100 = vector.load %arg0[%99, %c0_56, %c0_57] : memref<8x2x32xf32, #tpu.memory_space<vmem>>, vector<1x2x32xf32>
    %101 = vector.shape_cast %100 : vector<1x2x32xf32> to vector<2x32xf32>
    %cst_58 = arith.constant dense<0.000000e+00> : vector<2x512xf32>
    %102 = tpu.matmul %101, %0, %cst_58 {dimension_numbers = #tpu.dot_dimension_numbers<[1], [0], [0], [1], [0, 0, 1, 1], [], []>} : vector<2x32xf32>, vector<32x512xf32>, vector<2x512xf32> -> vector<2x512xf32>
    %103 = arith.addf %102, %5 : vector<2x512xf32>
    %104 = arith.index_cast %c6_i32 : i32 to index
    %c0_59 = arith.constant 0 : index
    %c0_60 = arith.constant 0 : index
    %105 = vector.load %arg11[%104, %c0_59, %c0_60] : memref<8x2x512xf32, #tpu.memory_space<vmem>>, vector<1x2x512xf32>
    %106 = vector.shape_cast %105 : vector<1x2x512xf32> to vector<2x512xf32>
    %107 = vector.shape_cast %103 : vector<2x512xf32> to vector<1x2x512xf32>
    tpu.vector_store %arg11[%104, %c0_59, %c0_60], %107 {strides = array<i32>} : memref<8x2x512xf32, #tpu.memory_space<vmem>>, vector<1x2x512xf32>,
    %cst_61 = arith.constant dense<0.000000e+00> : vector<2x512xf32>
    %108 = tpu.matmul %101, %1, %cst_61 {dimension_numbers = #tpu.dot_dimension_numbers<[1], [0], [0], [1], [0, 0, 1, 1], [], []>} : vector<2x32xf32>, vector<32x512xf32>, vector<2x512xf32> -> vector<2x512xf32>
    %109 = arith.addf %108, %8 : vector<2x512xf32>
    %110 = arith.index_cast %c6_i32 : i32 to index
    %c0_62 = arith.constant 0 : index
    %c0_63 = arith.constant 0 : index
    %111 = vector.load %arg12[%110, %c0_62, %c0_63] : memref<8x2x512xf32, #tpu.memory_space<vmem>>, vector<1x2x512xf32>
    %112 = vector.shape_cast %111 : vector<1x2x512xf32> to vector<2x512xf32>
    %113 = vector.shape_cast %109 : vector<2x512xf32> to vector<1x2x512xf32>
    tpu.vector_store %arg12[%110, %c0_62, %c0_63], %113 {strides = array<i32>} : memref<8x2x512xf32, #tpu.memory_space<vmem>>, vector<1x2x512xf32>,
    %c7_i32 = arith.constant 7 : i32
    %114 = arith.index_cast %c7_i32 : i32 to index
    %c0_64 = arith.constant 0 : index
    %c0_65 = arith.constant 0 : index
    %115 = vector.load %arg0[%114, %c0_64, %c0_65] : memref<8x2x32xf32, #tpu.memory_space<vmem>>, vector<1x2x32xf32>
    %116 = vector.shape_cast %115 : vector<1x2x32xf32> to vector<2x32xf32>
    %cst_66 = arith.constant dense<0.000000e+00> : vector<2x512xf32>
    %117 = tpu.matmul %116, %0, %cst_66 {dimension_numbers = #tpu.dot_dimension_numbers<[1], [0], [0], [1], [0, 0, 1, 1], [], []>} : vector<2x32xf32>, vector<32x512xf32>, vector<2x512xf32> -> vector<2x512xf32>
    %118 = arith.addf %117, %5 : vector<2x512xf32>
    %119 = arith.index_cast %c7_i32 : i32 to index
    %c0_67 = arith.constant 0 : index
    %c0_68 = arith.constant 0 : index
    %120 = vector.load %arg11[%119, %c0_67, %c0_68] : memref<8x2x512xf32, #tpu.memory_space<vmem>>, vector<1x2x512xf32>
    %121 = vector.shape_cast %120 : vector<1x2x512xf32> to vector<2x512xf32>
    %122 = vector.shape_cast %118 : vector<2x512xf32> to vector<1x2x512xf32>
    tpu.vector_store %arg11[%119, %c0_67, %c0_68], %122 {strides = array<i32>} : memref<8x2x512xf32, #tpu.memory_space<vmem>>, vector<1x2x512xf32>,
    %cst_69 = arith.constant dense<0.000000e+00> : vector<2x512xf32>
    %123 = tpu.matmul %116, %1, %cst_69 {dimension_numbers = #tpu.dot_dimension_numbers<[1], [0], [0], [1], [0, 0, 1, 1], [], []>} : vector<2x32xf32>, vector<32x512xf32>, vector<2x512xf32> -> vector<2x512xf32>
    %124 = arith.addf %123, %8 : vector<2x512xf32>
    %125 = arith.index_cast %c7_i32 : i32 to index
    %c0_70 = arith.constant 0 : index
    %c0_71 = arith.constant 0 : index
    %126 = vector.load %arg12[%125, %c0_70, %c0_71] : memref<8x2x512xf32, #tpu.memory_space<vmem>>, vector<1x2x512xf32>
    %127 = vector.shape_cast %126 : vector<1x2x512xf32> to vector<2x512xf32>
    %128 = vector.shape_cast %124 : vector<2x512xf32> to vector<1x2x512xf32>
    tpu.vector_store %arg12[%125, %c0_70, %c0_71], %128 {strides = array<i32>} : memref<8x2x512xf32, #tpu.memory_space<vmem>>, vector<1x2x512xf32>,
    %c8_i32 = arith.constant 8 : i32
    %cst_72 = arith.constant 0.000000e+00 : f32
    %129 = vector.broadcast %cst_72 : f32 to vector<2x128xf32>
    %c0_73 = arith.constant 0 : index
    %c0_74 = arith.constant 0 : index
    %c0_75 = arith.constant 0 : index
    %130 = vector.load %arg11[%c0_73, %c0_74, %c0_75] : memref<8x2x512xf32, #tpu.memory_space<vmem>>, vector<1x2x512xf32>
    %131 = vector.shape_cast %130 : vector<1x2x512xf32> to vector<2x512xf32>
    %132 = vector.extract_strided_slice %131 {offsets = [0, 0], sizes = [2, 384], strides = [1, 1]} : vector<2x512xf32> to vector<2x384xf32>
    %133 = arith.negf %132 : vector<2x384xf32>
    %134 = math.exp %133 : vector<2x384xf32>
    %cst_76 = arith.constant 1.000000e+00 : f32
    %135 = vector.broadcast %cst_76 : f32 to vector<2x384xf32>
    %136 = arith.addf %135, %134 : vector<2x384xf32>
    %137 = arith.divf %135, %136 : vector<2x384xf32>
    %138 = vector.extract_strided_slice %131 {offsets = [0, 384], sizes = [2, 128], strides = [1, 1]} : vector<2x512xf32> to vector<2x128xf32>
    %139 = math.tanh %138 : vector<2x128xf32>
    %140 = vector.extract_strided_slice %137 {offsets = [0, 128], sizes = [2, 128], strides = [1, 1]} : vector<2x384xf32> to vector<2x128xf32>
    %141 = arith.mulf %140, %129 : vector<2x128xf32>
    %142 = vector.extract_strided_slice %137 {offsets = [0, 0], sizes = [2, 128], strides = [1, 1]} : vector<2x384xf32> to vector<2x128xf32>
    %143 = arith.mulf %142, %139 : vector<2x128xf32>
    %144 = arith.addf %141, %143 : vector<2x128xf32>
    %145 = vector.extract_strided_slice %137 {offsets = [0, 256], sizes = [2, 128], strides = [1, 1]} : vector<2x384xf32> to vector<2x128xf32>
    %146 = math.tanh %144 : vector<2x128xf32>
    %147 = arith.mulf %145, %146 : vector<2x128xf32>
    %c7 = arith.constant 7 : index
    %c0_77 = arith.constant 0 : index
    %c0_78 = arith.constant 0 : index
    %148 = vector.load %arg12[%c7, %c0_77, %c0_78] : memref<8x2x512xf32, #tpu.memory_space<vmem>>, vector<1x2x512xf32>
    %149 = vector.shape_cast %148 : vector<1x2x512xf32> to vector<2x512xf32>
    %150 = vector.extract_strided_slice %149 {offsets = [0, 0], sizes = [2, 384], strides = [1, 1]} : vector<2x512xf32> to vector<2x384xf32>
    %151 = arith.negf %150 : vector<2x384xf32>
    %152 = math.exp %151 : vector<2x384xf32>
    %cst_79 = arith.constant 1.000000e+00 : f32
    %153 = vector.broadcast %cst_79 : f32 to vector<2x384xf32>
    %154 = arith.addf %153, %152 : vector<2x384xf32>
    %155 = arith.divf %153, %154 : vector<2x384xf32>
    %156 = vector.extract_strided_slice %149 {offsets = [0, 384], sizes = [2, 128], strides = [1, 1]} : vector<2x512xf32> to vector<2x128xf32>
    %157 = math.tanh %156 : vector<2x128xf32>
    %158 = vector.extract_strided_slice %155 {offsets = [0, 128], sizes = [2, 128], strides = [1, 1]} : vector<2x384xf32> to vector<2x128xf32>
    %159 = arith.mulf %158, %129 : vector<2x128xf32>
    %160 = vector.extract_strided_slice %155 {offsets = [0, 0], sizes = [2, 128], strides = [1, 1]} : vector<2x384xf32> to vector<2x128xf32>
    %161 = arith.mulf %160, %157 : vector<2x128xf32>
    %162 = arith.addf %159, %161 : vector<2x128xf32>
    %163 = vector.extract_strided_slice %155 {offsets = [0, 256], sizes = [2, 128], strides = [1, 1]} : vector<2x384xf32> to vector<2x128xf32>
    %164 = math.tanh %162 : vector<2x128xf32>
    %165 = arith.mulf %163, %164 : vector<2x128xf32>
    %c1_i32_80 = arith.constant 1 : i32
    %166 = arith.index_cast %c1_i32_80 : i32 to index
    %c0_81 = arith.constant 0 : index
    %c0_82 = arith.constant 0 : index
    %167 = vector.load %arg11[%166, %c0_81, %c0_82] : memref<8x2x512xf32, #tpu.memory_space<vmem>>, vector<1x2x512xf32>
    %168 = vector.shape_cast %167 : vector<1x2x512xf32> to vector<2x512xf32>
    %cst_83 = arith.constant dense<0.000000e+00> : vector<2x512xf32>
    %169 = tpu.matmul %147, %2, %cst_83 {dimension_numbers = #tpu.dot_dimension_numbers<[1], [0], [0], [1], [0, 0, 1, 1], [], []>} : vector<2x128xf32>, vector<128x512xf32>, vector<2x512xf32> -> vector<2x512xf32>
    %170 = arith.addf %168, %169 : vector<2x512xf32>
    %171 = vector.extract_strided_slice %170 {offsets = [0, 0], sizes = [2, 384], strides = [1, 1]} : vector<2x512xf32> to vector<2x384xf32>
    %172 = arith.negf %171 : vector<2x384xf32>
    %173 = math.exp %172 : vector<2x384xf32>
    %cst_84 = arith.constant 1.000000e+00 : f32
    %174 = vector.broadcast %cst_84 : f32 to vector<2x384xf32>
    %175 = arith.addf %174, %173 : vector<2x384xf32>
    %176 = arith.divf %174, %175 : vector<2x384xf32>
    %177 = vector.extract_strided_slice %170 {offsets = [0, 384], sizes = [2, 128], strides = [1, 1]} : vector<2x512xf32> to vector<2x128xf32>
    %178 = math.tanh %177 : vector<2x128xf32>
    %179 = vector.extract_strided_slice %176 {offsets = [0, 128], sizes = [2, 128], strides = [1, 1]} : vector<2x384xf32> to vector<2x128xf32>
    %180 = arith.mulf %179, %144 : vector<2x128xf32>
    %181 = vector.extract_strided_slice %176 {offsets = [0, 0], sizes = [2, 128], strides = [1, 1]} : vector<2x384xf32> to vector<2x128xf32>
    %182 = arith.mulf %181, %178 : vector<2x128xf32>
    %183 = arith.addf %180, %182 : vector<2x128xf32>
    %184 = vector.extract_strided_slice %176 {offsets = [0, 256], sizes = [2, 128], strides = [1, 1]} : vector<2x384xf32> to vector<2x128xf32>
    %185 = math.tanh %183 : vector<2x128xf32>
    %186 = arith.mulf %184, %185 : vector<2x128xf32>
    %c2_i32_85 = arith.constant 2 : i32
    %187 = arith.index_cast %c2_i32_85 : i32 to index
    %c0_86 = arith.constant 0 : index
    %c0_87 = arith.constant 0 : index
    %188 = vector.load %arg11[%187, %c0_86, %c0_87] : memref<8x2x512xf32, #tpu.memory_space<vmem>>, vector<1x2x512xf32>
    %189 = vector.shape_cast %188 : vector<1x2x512xf32> to vector<2x512xf32>
    %cst_88 = arith.constant dense<0.000000e+00> : vector<2x512xf32>
    %190 = tpu.matmul %186, %2, %cst_88 {dimension_numbers = #tpu.dot_dimension_numbers<[1], [0], [0], [1], [0, 0, 1, 1], [], []>} : vector<2x128xf32>, vector<128x512xf32>, vector<2x512xf32> -> vector<2x512xf32>
    %191 = arith.addf %189, %190 : vector<2x512xf32>
    %192 = vector.extract_strided_slice %191 {offsets = [0, 0], sizes = [2, 384], strides = [1, 1]} : vector<2x512xf32> to vector<2x384xf32>
    %193 = arith.negf %192 : vector<2x384xf32>
    %194 = math.exp %193 : vector<2x384xf32>
    %cst_89 = arith.constant 1.000000e+00 : f32
    %195 = vector.broadcast %cst_89 : f32 to vector<2x384xf32>
    %196 = arith.addf %195, %194 : vector<2x384xf32>
    %197 = arith.divf %195, %196 : vector<2x384xf32>
    %198 = vector.extract_strided_slice %191 {offsets = [0, 384], sizes = [2, 128], strides = [1, 1]} : vector<2x512xf32> to vector<2x128xf32>
    %199 = math.tanh %198 : vector<2x128xf32>
    %200 = vector.extract_strided_slice %197 {offsets = [0, 128], sizes = [2, 128], strides = [1, 1]} : vector<2x384xf32> to vector<2x128xf32>
    %201 = arith.mulf %200, %183 : vector<2x128xf32>
    %202 = vector.extract_strided_slice %197 {offsets = [0, 0], sizes = [2, 128], strides = [1, 1]} : vector<2x384xf32> to vector<2x128xf32>
    %203 = arith.mulf %202, %199 : vector<2x128xf32>
    %204 = arith.addf %201, %203 : vector<2x128xf32>
    %205 = vector.extract_strided_slice %197 {offsets = [0, 256], sizes = [2, 128], strides = [1, 1]} : vector<2x384xf32> to vector<2x128xf32>
    %206 = math.tanh %204 : vector<2x128xf32>
    %207 = arith.mulf %205, %206 : vector<2x128xf32>
    %c3_i32_90 = arith.constant 3 : i32
    %208 = arith.index_cast %c3_i32_90 : i32 to index
    %c0_91 = arith.constant 0 : index
    %c0_92 = arith.constant 0 : index
    %209 = vector.load %arg11[%208, %c0_91, %c0_92] : memref<8x2x512xf32, #tpu.memory_space<vmem>>, vector<1x2x512xf32>
    %210 = vector.shape_cast %209 : vector<1x2x512xf32> to vector<2x512xf32>
    %cst_93 = arith.constant dense<0.000000e+00> : vector<2x512xf32>
    %211 = tpu.matmul %207, %2, %cst_93 {dimension_numbers = #tpu.dot_dimension_numbers<[1], [0], [0], [1], [0, 0, 1, 1], [], []>} : vector<2x128xf32>, vector<128x512xf32>, vector<2x512xf32> -> vector<2x512xf32>
    %212 = arith.addf %210, %211 : vector<2x512xf32>
    %213 = vector.extract_strided_slice %212 {offsets = [0, 0], sizes = [2, 384], strides = [1, 1]} : vector<2x512xf32> to vector<2x384xf32>
    %214 = arith.negf %213 : vector<2x384xf32>
    %215 = math.exp %214 : vector<2x384xf32>
    %cst_94 = arith.constant 1.000000e+00 : f32
    %216 = vector.broadcast %cst_94 : f32 to vector<2x384xf32>
    %217 = arith.addf %216, %215 : vector<2x384xf32>
    %218 = arith.divf %216, %217 : vector<2x384xf32>
    %219 = vector.extract_strided_slice %212 {offsets = [0, 384], sizes = [2, 128], strides = [1, 1]} : vector<2x512xf32> to vector<2x128xf32>
    %220 = math.tanh %219 : vector<2x128xf32>
    %221 = vector.extract_strided_slice %218 {offsets = [0, 128], sizes = [2, 128], strides = [1, 1]} : vector<2x384xf32> to vector<2x128xf32>
    %222 = arith.mulf %221, %204 : vector<2x128xf32>
    %223 = vector.extract_strided_slice %218 {offsets = [0, 0], sizes = [2, 128], strides = [1, 1]} : vector<2x384xf32> to vector<2x128xf32>
    %224 = arith.mulf %223, %220 : vector<2x128xf32>
    %225 = arith.addf %222, %224 : vector<2x128xf32>
    %226 = vector.extract_strided_slice %218 {offsets = [0, 256], sizes = [2, 128], strides = [1, 1]} : vector<2x384xf32> to vector<2x128xf32>
    %227 = math.tanh %225 : vector<2x128xf32>
    %228 = arith.mulf %226, %227 : vector<2x128xf32>
    %c4_i32_95 = arith.constant 4 : i32
    %229 = arith.index_cast %c4_i32_95 : i32 to index
    %c0_96 = arith.constant 0 : index
    %c0_97 = arith.constant 0 : index
    %230 = vector.load %arg11[%229, %c0_96, %c0_97] : memref<8x2x512xf32, #tpu.memory_space<vmem>>, vector<1x2x512xf32>
    %231 = vector.shape_cast %230 : vector<1x2x512xf32> to vector<2x512xf32>
    %cst_98 = arith.constant dense<0.000000e+00> : vector<2x512xf32>
    %232 = tpu.matmul %228, %2, %cst_98 {dimension_numbers = #tpu.dot_dimension_numbers<[1], [0], [0], [1], [0, 0, 1, 1], [], []>} : vector<2x128xf32>, vector<128x512xf32>, vector<2x512xf32> -> vector<2x512xf32>
    %233 = arith.addf %231, %232 : vector<2x512xf32>
    %234 = vector.extract_strided_slice %233 {offsets = [0, 0], sizes = [2, 384], strides = [1, 1]} : vector<2x512xf32> to vector<2x384xf32>
    %235 = arith.negf %234 : vector<2x384xf32>
    %236 = math.exp %235 : vector<2x384xf32>
    %cst_99 = arith.constant 1.000000e+00 : f32
    %237 = vector.broadcast %cst_99 : f32 to vector<2x384xf32>
    %238 = arith.addf %237, %236 : vector<2x384xf32>
    %239 = arith.divf %237, %238 : vector<2x384xf32>
    %240 = vector.extract_strided_slice %233 {offsets = [0, 384], sizes = [2, 128], strides = [1, 1]} : vector<2x512xf32> to vector<2x128xf32>
    %241 = math.tanh %240 : vector<2x128xf32>
    %242 = vector.extract_strided_slice %239 {offsets = [0, 128], sizes = [2, 128], strides = [1, 1]} : vector<2x384xf32> to vector<2x128xf32>
    %243 = arith.mulf %242, %225 : vector<2x128xf32>
    %244 = vector.extract_strided_slice %239 {offsets = [0, 0], sizes = [2, 128], strides = [1, 1]} : vector<2x384xf32> to vector<2x128xf32>
    %245 = arith.mulf %244, %241 : vector<2x128xf32>
    %246 = arith.addf %243, %245 : vector<2x128xf32>
    %247 = vector.extract_strided_slice %239 {offsets = [0, 256], sizes = [2, 128], strides = [1, 1]} : vector<2x384xf32> to vector<2x128xf32>
    %248 = math.tanh %246 : vector<2x128xf32>
    %249 = arith.mulf %247, %248 : vector<2x128xf32>
    %c5_i32_100 = arith.constant 5 : i32
    %250 = arith.index_cast %c5_i32_100 : i32 to index
    %c0_101 = arith.constant 0 : index
    %c0_102 = arith.constant 0 : index
    %251 = vector.load %arg11[%250, %c0_101, %c0_102] : memref<8x2x512xf32, #tpu.memory_space<vmem>>, vector<1x2x512xf32>
    %252 = vector.shape_cast %251 : vector<1x2x512xf32> to vector<2x512xf32>
    %cst_103 = arith.constant dense<0.000000e+00> : vector<2x512xf32>
    %253 = tpu.matmul %249, %2, %cst_103 {dimension_numbers = #tpu.dot_dimension_numbers<[1], [0], [0], [1], [0, 0, 1, 1], [], []>} : vector<2x128xf32>, vector<128x512xf32>, vector<2x512xf32> -> vector<2x512xf32>
    %254 = arith.addf %252, %253 : vector<2x512xf32>
    %255 = vector.extract_strided_slice %254 {offsets = [0, 0], sizes = [2, 384], strides = [1, 1]} : vector<2x512xf32> to vector<2x384xf32>
    %256 = arith.negf %255 : vector<2x384xf32>
    %257 = math.exp %256 : vector<2x384xf32>
    %cst_104 = arith.constant 1.000000e+00 : f32
    %258 = vector.broadcast %cst_104 : f32 to vector<2x384xf32>
    %259 = arith.addf %258, %257 : vector<2x384xf32>
    %260 = arith.divf %258, %259 : vector<2x384xf32>
    %261 = vector.extract_strided_slice %254 {offsets = [0, 384], sizes = [2, 128], strides = [1, 1]} : vector<2x512xf32> to vector<2x128xf32>
    %262 = math.tanh %261 : vector<2x128xf32>
    %263 = vector.extract_strided_slice %260 {offsets = [0, 128], sizes = [2, 128], strides = [1, 1]} : vector<2x384xf32> to vector<2x128xf32>
    %264 = arith.mulf %263, %246 : vector<2x128xf32>
    %265 = vector.extract_strided_slice %260 {offsets = [0, 0], sizes = [2, 128], strides = [1, 1]} : vector<2x384xf32> to vector<2x128xf32>
    %266 = arith.mulf %265, %262 : vector<2x128xf32>
    %267 = arith.addf %264, %266 : vector<2x128xf32>
    %268 = vector.extract_strided_slice %260 {offsets = [0, 256], sizes = [2, 128], strides = [1, 1]} : vector<2x384xf32> to vector<2x128xf32>
    %269 = math.tanh %267 : vector<2x128xf32>
    %270 = arith.mulf %268, %269 : vector<2x128xf32>
    %c6_i32_105 = arith.constant 6 : i32
    %271 = arith.index_cast %c6_i32_105 : i32 to index
    %c0_106 = arith.constant 0 : index
    %c0_107 = arith.constant 0 : index
    %272 = vector.load %arg11[%271, %c0_106, %c0_107] : memref<8x2x512xf32, #tpu.memory_space<vmem>>, vector<1x2x512xf32>
    %273 = vector.shape_cast %272 : vector<1x2x512xf32> to vector<2x512xf32>
    %cst_108 = arith.constant dense<0.000000e+00> : vector<2x512xf32>
    %274 = tpu.matmul %270, %2, %cst_108 {dimension_numbers = #tpu.dot_dimension_numbers<[1], [0], [0], [1], [0, 0, 1, 1], [], []>} : vector<2x128xf32>, vector<128x512xf32>, vector<2x512xf32> -> vector<2x512xf32>
    %275 = arith.addf %273, %274 : vector<2x512xf32>
    %276 = vector.extract_strided_slice %275 {offsets = [0, 0], sizes = [2, 384], strides = [1, 1]} : vector<2x512xf32> to vector<2x384xf32>
    %277 = arith.negf %276 : vector<2x384xf32>
    %278 = math.exp %277 : vector<2x384xf32>
    %cst_109 = arith.constant 1.000000e+00 : f32
    %279 = vector.broadcast %cst_109 : f32 to vector<2x384xf32>
    %280 = arith.addf %279, %278 : vector<2x384xf32>
    %281 = arith.divf %279, %280 : vector<2x384xf32>
    %282 = vector.extract_strided_slice %275 {offsets = [0, 384], sizes = [2, 128], strides = [1, 1]} : vector<2x512xf32> to vector<2x128xf32>
    %283 = math.tanh %282 : vector<2x128xf32>
    %284 = vector.extract_strided_slice %281 {offsets = [0, 128], sizes = [2, 128], strides = [1, 1]} : vector<2x384xf32> to vector<2x128xf32>
    %285 = arith.mulf %284, %267 : vector<2x128xf32>
    %286 = vector.extract_strided_slice %281 {offsets = [0, 0], sizes = [2, 128], strides = [1, 1]} : vector<2x384xf32> to vector<2x128xf32>
    %287 = arith.mulf %286, %283 : vector<2x128xf32>
    %288 = arith.addf %285, %287 : vector<2x128xf32>
    %289 = vector.extract_strided_slice %281 {offsets = [0, 256], sizes = [2, 128], strides = [1, 1]} : vector<2x384xf32> to vector<2x128xf32>
    %290 = math.tanh %288 : vector<2x128xf32>
    %291 = arith.mulf %289, %290 : vector<2x128xf32>
    %c7_i32_110 = arith.constant 7 : i32
    %292 = arith.index_cast %c7_i32_110 : i32 to index
    %c0_111 = arith.constant 0 : index
    %c0_112 = arith.constant 0 : index
    %293 = vector.load %arg11[%292, %c0_111, %c0_112] : memref<8x2x512xf32, #tpu.memory_space<vmem>>, vector<1x2x512xf32>
    %294 = vector.shape_cast %293 : vector<1x2x512xf32> to vector<2x512xf32>
    %cst_113 = arith.constant dense<0.000000e+00> : vector<2x512xf32>
    %295 = tpu.matmul %291, %2, %cst_113 {dimension_numbers = #tpu.dot_dimension_numbers<[1], [0], [0], [1], [0, 0, 1, 1], [], []>} : vector<2x128xf32>, vector<128x512xf32>, vector<2x512xf32> -> vector<2x512xf32>
    %296 = arith.addf %294, %295 : vector<2x512xf32>
    %297 = vector.extract_strided_slice %296 {offsets = [0, 0], sizes = [2, 384], strides = [1, 1]} : vector<2x512xf32> to vector<2x384xf32>
    %298 = arith.negf %297 : vector<2x384xf32>
    %299 = math.exp %298 : vector<2x384xf32>
    %cst_114 = arith.constant 1.000000e+00 : f32
    %300 = vector.broadcast %cst_114 : f32 to vector<2x384xf32>
    %301 = arith.addf %300, %299 : vector<2x384xf32>
    %302 = arith.divf %300, %301 : vector<2x384xf32>
    %303 = vector.extract_strided_slice %296 {offsets = [0, 384], sizes = [2, 128], strides = [1, 1]} : vector<2x512xf32> to vector<2x128xf32>
    %304 = math.tanh %303 : vector<2x128xf32>
    %305 = vector.extract_strided_slice %302 {offsets = [0, 128], sizes = [2, 128], strides = [1, 1]} : vector<2x384xf32> to vector<2x128xf32>
    %306 = arith.mulf %305, %288 : vector<2x128xf32>
    %307 = vector.extract_strided_slice %302 {offsets = [0, 0], sizes = [2, 128], strides = [1, 1]} : vector<2x384xf32> to vector<2x128xf32>
    %308 = arith.mulf %307, %304 : vector<2x128xf32>
    %309 = arith.addf %306, %308 : vector<2x128xf32>
    %310 = vector.extract_strided_slice %302 {offsets = [0, 256], sizes = [2, 128], strides = [1, 1]} : vector<2x384xf32> to vector<2x128xf32>
    %311 = math.tanh %309 : vector<2x128xf32>
    %312 = arith.mulf %310, %311 : vector<2x128xf32>
    %c7_i32_115 = arith.constant 7 : i32
    %c0_116 = arith.constant 0 : index
    %c0_117 = arith.constant 0 : index
    %313 = vector.load %arg7[%c0_116, %c0_117] : memref<128x8xf32, #tpu.memory_space<vmem>>, vector<128x8xf32>
    %cst_118 = arith.constant dense<0.000000e+00> : vector<2x8xf32>
    %314 = tpu.matmul %312, %313, %cst_118 {dimension_numbers = #tpu.dot_dimension_numbers<[1], [0], [0], [1], [0, 0, 1, 1], [], []>} : vector<2x128xf32>, vector<128x8xf32>, vector<2x8xf32> -> vector<2x8xf32>
    %c0_119 = arith.constant 0 : index
    %c0_120 = arith.constant 0 : index
    %315 = vector.load %arg8[%c0_119, %c0_120] : memref<128x8xf32, #tpu.memory_space<vmem>>, vector<128x8xf32>
    %cst_121 = arith.constant dense<0.000000e+00> : vector<2x8xf32>
    %316 = tpu.matmul %165, %315, %cst_121 {dimension_numbers = #tpu.dot_dimension_numbers<[1], [0], [0], [1], [0, 0, 1, 1], [], []>} : vector<2x128xf32>, vector<128x8xf32>, vector<2x8xf32> -> vector<2x8xf32>
    %317 = arith.addf %314, %316 : vector<2x8xf32>
    %c0_122 = arith.constant 0 : index
    %c0_123 = arith.constant 0 : index
    %318 = vector.load %arg9[%c0_122, %c0_123] : memref<1x8xf32, #tpu.memory_space<vmem>>, vector<1x8xf32>
    %319 = vector.broadcast %318 : vector<1x8xf32> to vector<2x8xf32>
    %320 = arith.addf %317, %319 : vector<2x8xf32>
    %c0_124 = arith.constant 0 : index
    %c0_125 = arith.constant 0 : index
    %321 = vector.load %arg10[%c0_124, %c0_125] : memref<2x8xf32, #tpu.memory_space<vmem>>, vector<2x8xf32>
    tpu.vector_store %arg10[%c0_124, %c0_125], %320 {strides = array<i32>} : memref<2x8xf32, #tpu.memory_space<vmem>>, vector<2x8xf32>,
    return
  }
}

</mosaic_0001>

<bundles_post_ra>
// kernel: bilstm_dropout_forward.1
= control target key start
LH: loop header
LB: loop body
LE: loop exit
PB: predicated region body
PF: predicated region fallthrough
CT: control target
= control target key end

     0   :  { %15 = vsyncpa [#allocation5], 0  ;;  %s6704_s0 = inlined_call_operand.vmem [shape: f32[8,2,32], index: 0, kind: input, shape index: {}]   ;;  %s6705_s1 = inlined_call_operand.hbm [shape: f32[32,512], index: 1, kind: input, shape index: {}]   ;;  %s6706_s2 = inlined_call_operand.hbm [shape: f32[32,512], index: 2, kind: input, shape index: {}]   ;;  %s6707_s3 = inlined_call_operand.vmem [shape: f32[128,512], index: 3, kind: input, shape index: {}]   ;;  %s6708_s4 = inlined_call_operand.hbm [shape: f32[128,512], index: 4, kind: input, shape index: {}]   ;;  %s6709_s5 = inlined_call_operand.vmem [shape: f32[1,512], index: 5, kind: input, shape index: {}]   ;;  %s6710_s6 = inlined_call_operand.vmem [shape: f32[1,512], index: 6, kind: input, shape index: {}]   ;;  %s6711_s7 = inlined_call_operand.vmem [shape: f32[128,8], index: 7, kind: input, shape index: {}]   ;;  %s6712_s8 = inlined_call_operand.vmem [shape: f32[128,8], index: 8, kind: input, shape index: {}]   ;;  %s6713_s9 = inlined_call_operand.vmem [shape: f32[1,8], index: 9, kind: input, shape index: {}]   ;;  %s6714_s10 = inlined_call_operand.hbm [shape: f32[2,8], index: 10, kind: output, shape index: {}]  }
   0x1   :  { %16 = vsyncpa [#allocation8], 0 }
   0x2   :  { %17 = vsyncpa [#allocation6], 0  ;;  %s5534_s13 = smov [#allocation7]   ;;  %s5535_s15 = smov [#allocation4]  }
   0x3   :  { %s37_s14 = sshll.u32 %s5534_s13, 4  ;;  %s25_s16 = sshll.u32 %s5535_s15, 4  ;;  %s38_s14 = int_to_ptr.vmem [resolvable:$true] %s37_s14  ;;  %s5599_s16 = int_to_ptr.vmem [resolvable:$true] %s25_s16 }
   0x4   :  { %s5440_s19 = scalar_lea.hbm %s6706_s2, 2048 }
   0x5   :  { %p5441_p0 = scmp.ne.s32.totalorder %s6706_s2, %s5440_s19  ;;  %p5444_p1 = scmp.lt.u32.totalorder %s5440_s19, %s6706_s2 }
   0x7   :  { %p5446_p2 = pnand %p5444_p1, %p5441_p0 }
   0x9   :  { %5449 = shalt.err (!%p5446_p2)
}
   0xa   :  { %s5450_s24 = scalar_lea.vmem %s38_s14, 2048  ;;  %p5455_p4 = scmp.lt.s32.totalorder %s38_s14, %s38_s14 }
   0xb   :  { %p5451_p3 = scmp.ne.s32.totalorder %s38_s14, %s5450_s24  ;;  %p5456_p5 = scmp.lt.s32.totalorder %s5450_s24, %s5450_s24 }
   0xd   :  { %p5457_p6 = por %p5456_p5, %p5455_p4 }
   0xf   :  { %p5458_p7 = pnand %p5457_p6, %p5451_p3 }
  0x11   :  { %5461 = shalt.err (!%p5458_p7)
}
  0x12   :  { %s5536_s25 = smov 512   ;;  %s5537_s26 = smov 32  }
  0x13   :  { %43 = dma.hbm_to_vmem [thread:$0]  %s6706_s2, 2048, %s38_s14, [#allocation8], %s5536_s25, %s5536_s25, %s5537_s26  }
  0x14   :  { %s5462_s11 = scalar_lea.hbm %s6705_s1, 2048 }
  0x15   :  { %p5463_p8 = scmp.ne.s32.totalorder %s6705_s1, %s5462_s11  ;;  %p5466_p9 = scmp.lt.u32.totalorder %s5462_s11, %s6705_s1 }
  0x17   :  { %p5468_p10 = pnand %p5466_p9, %p5463_p8 }
  0x19   :  { %5471 = shalt.err (!%p5468_p10)
}
  0x1a   :  { %s5472_s18 = scalar_lea.vmem %s5599_s16, 2048  ;;  %p5477_p12 = scmp.lt.s32.totalorder %s5599_s16, %s5599_s16 }
  0x1b   :  { %p5473_p11 = scmp.ne.s32.totalorder %s5599_s16, %s5472_s18  ;;  %p5478_p13 = scmp.lt.s32.totalorder %s5472_s18, %s5472_s18 }
  0x1d   :  { %p5479_p0 = por %p5478_p13, %p5477_p12 }
  0x1f   :  { %p5480_p1 = pnand %p5479_p0, %p5473_p11 }
  0x21   :  { %5483 = shalt.err (!%p5480_p1)
}
  0x22   :  { %31 = dma.hbm_to_vmem [thread:$0]  %s6705_s1, 2048, %s5599_s16, [#allocation5], %s5536_s25, %s5536_s25, %s5537_s26  }
  0x23   :  { %s5538_s19 = smov [#allocation9]   ;;  %s5484_s23 = scalar_lea.hbm %s6708_s4, 8192 }
  0x24   :  { %s51_s20 = sshll.u32 %s5538_s19, 4  ;;  %p5485_p2 = scmp.ne.s32.totalorder %s6708_s4, %s5484_s23  ;;  %s52_s20 = int_to_ptr.vmem [resolvable:$true] %s51_s20 }
  0x25   :  { %p5488_p3 = scmp.lt.u32.totalorder %s5484_s23, %s6708_s4 }
  0x27   :  { %p5490_p4 = pnand %p5488_p3, %p5485_p2 }
  0x29   :  { %5493 = shalt.err (!%p5490_p4)
}
  0x2a   :  { %s5494_s30 = scalar_lea.vmem %s52_s20, 8192  ;;  %p5499_p6 = scmp.lt.s32.totalorder %s52_s20, %s52_s20 }
  0x2b   :  { %p5495_p5 = scmp.ne.s32.totalorder %s52_s20, %s5494_s30  ;;  %p5500_p7 = scmp.lt.s32.totalorder %s5494_s30, %s5494_s30 }
  0x2d   :  { %p5501_p8 = por %p5500_p7, %p5499_p6 }
  0x2f   :  { %p5502_p9 = pnand %p5501_p8, %p5495_p5 }
  0x31   :  { %5505 = shalt.err (!%p5502_p9)
}
  0x32   :  { %57 = dma.hbm_to_vmem [thread:$0]  %s6708_s4, 8192, %s52_s20, [#allocation8], %s5536_s25, %s5536_s25, %s5537_s26  }
  0x33   :  { %5528 = dma.done.wait [#allocation5], 2048  }
  0x34   :  { %5529 = vsyncadd [#allocation5], 4294965248 }
  0x35   :  { %5530 = dma.done.wait [#allocation8], 10240  }
  0x36   :  { %5531 = vsyncadd [#allocation8], 4294957056  ;;  %v6716_v0 = vmov 0.0   ;;  %v78_v1 = vld [vmem:[#allocation4 + $0x8] sm:$0xff]  ;;  %v80_v3 = vld [vmem:[#allocation4 + $0x18] sm:$0xff]  ;;  %vm218_vm0 = vcmask 261120  }
  0x37   :  { %286 = vmatprep.mubr.f32.mxu0 %v6716_v0  ;;  %357 = vmatprep.mubr.f32.mxu1 %v6716_v0  ;;  %v82_v2 = vld [vmem:[#allocation4 + $0x28] sm:$0xff]  ;;  %v84_v5 = vld [vmem:[#allocation4 + $0x38] sm:$0xff]  ;;  %v77_v6 = vld [vmem:[#allocation4] sm:$0xff]  ;;  %vm5542_vm1 = vmmov 0   ;;  %s5543_s14 = smov [#allocation10]   ;;  %vm4435_vm2 = vcmask 58368  }
  0x38   :  { %v5653_v4 = vpack.c.bf16 %v82_v2, %v78_v1  ;;  %v81_v7 = vld [vmem:[#allocation4 + $0x20] sm:$0xff]  ;;  %v5655_v8 = vpack.c.bf16 %v84_v5, %v80_v3  ;;  %v79_v10 = vld [vmem:[#allocation4 + $0x10] sm:$0xff]  ;;  %v86_v12 = vld [vmem:[#allocation4 + $0x48] sm:$0xff]  ;;  %s4443_s19 = sshll.u32 %s5543_s14, 4  ;;  %s4444_s19 = int_to_ptr.vmem [resolvable:$true] %s4443_s19 }
  0x39   :  { %v5657_v9 = vpack.c.bf16 %v81_v7, %v77_v6  ;;  %v83_v11 = vld [vmem:[#allocation4 + $0x30] sm:$0xff]  ;;  %v90_v14 = vld [vmem:[#allocation4 + $0x68] sm:$0xff]  ;;  %v88_v15 = vld [vmem:[#allocation4 + $0x58] sm:$0xff]  ;;  %s5506_s20 = scalar_lea.vmem %s4444_s19, 32  ;;  %p5511_p11 = scmp.lt.s32.totalorder %s4444_s19, %s4444_s19 }
  0x3a   :  { %4607 = vmatprep.subr.bf16.mxu0 %v5653_v4  ;;  %v5660_v13 = vpack.c.bf16 %v83_v11, %v79_v10  ;;  %v92_v16 = vld [vmem:[#allocation4 + $0x78] sm:$0xff]  ;;  %4615 = vmatprep.subr.bf16.mxu1 %v5655_v8  ;;  %v5664_v17 = vpack.c.bf16 %v90_v14, %v86_v12  ;;  %v85_v19 = vld [vmem:[#allocation4 + $0x40] sm:$0xff]  ;;  %v87_v21 = vld [vmem:[#allocation4 + $0x50] sm:$0xff]  ;;  %p5507_p10 = scmp.ne.s32.totalorder %s4444_s19, %s5506_s20  ;;  %p5512_p12 = scmp.lt.s32.totalorder %s5506_s20, %s5506_s20 }
  0x3b   :  { %4609 = vmatpush1.bf16.msra.mxu0 %v5657_v9  ;;  %v5666_v18 = vpack.c.bf16 %v92_v16, %v88_v15  ;;  %v89_v20 = vld [vmem:[#allocation4 + $0x60] sm:$0xff]  ;;  %v91_v23 = vld [vmem:[#allocation4 + $0x70] sm:$0xff]  ;;  %v94_v24 = vld [vmem:[#allocation7 + $0x8] sm:$0xff] }
  0x3c   :  { %4617 = vmatpush1.bf16.msra.mxu1 %v5660_v13  ;;  %v5669_v22 = vpack.c.bf16 %v89_v20, %v85_v19  ;;  %4611 = vmatprep.subr.bf16.mxu0 %v5664_v17  ;;  %v5673_v25 = vpack.c.bf16 %v91_v23, %v87_v21  ;;  %v217_v26 = vld [vmem:[%s6704_s0] sm:$0x3]  ;;  %v98_v27 = vld [vmem:[#allocation7 + $0x28] sm:$0xff]  ;;  %v96_v28 = vld [vmem:[#allocation7 + $0x18] sm:$0xff]  ;;  %p5513_p13 = por %p5512_p12, %p5511_p11 }
  0x3d   :  { %4619 = vmatprep.subr.bf16.mxu1 %v5666_v18  ;;  %v100_v29 = vld [vmem:[#allocation7 + $0x38] sm:$0xff]  ;;  %v5678_v30 = vpack.c.bf16 %v98_v27, %v94_v24  ;;  %v93_v32 = vld [vmem:[#allocation7] sm:$0xff]  ;;  %v95_v34 = vld [vmem:[#allocation7 + $0x10] sm:$0xff] }
  0x3e   :  { %v5680_v31 = vpack.c.bf16 %v100_v29, %v96_v28  ;;  %v97_v33 = vld [vmem:[#allocation7 + $0x20] sm:$0xff]  ;;  %v99_v36 = vld [vmem:[#allocation7 + $0x30] sm:$0xff]  ;;  %v102_v37 = vld [vmem:[#allocation7 + $0x48] sm:$0xff]  ;;  %p5514_p0 = pnand %p5513_p13, %p5507_p10 }
  0x3f   :  { %4613 = vmatpush1.bf16.msra.mxu0 %v5669_v22  ;;  %v5683_v35 = vpack.c.bf16 %v97_v33, %v93_v32  ;;  %v106_v38 = vld [vmem:[#allocation7 + $0x68] sm:$0xff]  ;;  %v5687_v39 = vpack.c.bf16 %v99_v36, %v95_v34  ;;  %v104_v41 = vld [vmem:[#allocation7 + $0x58] sm:$0xff]  ;;  %v101_v43 = vld [vmem:[#allocation7 + $0x40] sm:$0xff] }
  0x40   :  { %4621 = vmatpush1.bf16.msra.mxu1 %v5673_v25  ;;  %4623 = vmatprep.subr.bf16.mxu0 %v5678_v30  ;;  %v5689_v40 = vpack.c.bf16 %v106_v38, %v102_v37  ;;  %v108_v42 = vld [vmem:[#allocation7 + $0x78] sm:$0xff]  ;;  %v105_v45 = vld [vmem:[#allocation7 + $0x60] sm:$0xff]  ;;  %v103_v46 = vld [vmem:[#allocation7 + $0x50] sm:$0xff] }
  0x41   :  { %4631 = vmatprep.subr.bf16.mxu1 %v5680_v31  ;;  %v5692_v44 = vpack.c.bf16 %v108_v42, %v104_v41  ;;  %v107_v47 = vld [vmem:[#allocation7 + $0x70] sm:$0xff]  ;;  %v5697_v48 = vpack.c.bf16 %v105_v45, %v101_v43  ;;  %v4457_v50 = vld [vmem:[%s6704_s0 + $0x2] sm:$0x3]  ;;  %v4462_v51 = vld [vmem:[%s6704_s0 + $0x4] sm:$0x3] }
  0x42   :  { %4453 = vmatmul.mubr.msk.f32.vlgmr.msra.gmra.mrb[0].mxu0 %vm218_vm0, %v217_v26  ;;  %v5701_v49 = vpack.c.bf16 %v107_v47, %v103_v46  ;;  %v4467_v52 = vld [vmem:[%s6704_s0 + $0x6] sm:$0x3]  ;;  %v4472_v53 = vld [vmem:[%s6704_s0 + $0x8] sm:$0x3]  ;;  %v4477_v54 = vld [vmem:[%s6704_s0 + $0xa] sm:$0x3] }
  0x43   :  { %4454 = vmatmul.mubr.msk.f32.vlgmr.msra.gmra.mrb[0].mxu1 %vm218_vm0, %v217_v26  ;;  %4625 = vmatpush1.bf16.msra.mxu0 %v5683_v35  ;;  %v4482_v55 = vld [vmem:[%s6704_s0 + $0xc] sm:$0x3]  ;;  %v4487_v56 = vld [vmem:[%s6704_s0 + $0xe] sm:$0x3]  ;;  %v112_v59 = vld [vmem:[%s6707_s3 + $0x18] sm:$0xff] }
  0x44   :  { %4633 = vmatpush1.bf16.msra.mxu1 %v5687_v39  ;;  %4627 = vmatprep.subr.bf16.mxu0 %v5689_v40  ;;  %v110_v57 = vld [vmem:[%s6707_s3 + $0x8] sm:$0xff]  ;;  %v116_v60 = vld [vmem:[%s6707_s3 + $0x38] sm:$0xff]  ;;  %v109_v62 = vld [vmem:[%s6707_s3] sm:$0xff] }
  0x45   :  { %4635 = vmatprep.subr.bf16.mxu1 %v5692_v44  ;;  %451 = vmatprep.mubr.f32.mxu0 %v6716_v0  ;;  %v114_v58 = vld [vmem:[%s6707_s3 + $0x28] sm:$0xff]  ;;  %v113_v63 = vld [vmem:[%s6707_s3 + $0x20] sm:$0xff]  ;;  %v111_v1 = vld [vmem:[%s6707_s3 + $0x10] sm:$0xff]  ;;  %v5917_v2 = vpack.c.bf16 %v116_v60, %v112_v59 }
  0x46   :  { %522 = vmatprep.mubr.f32.mxu1 %v6716_v0  ;;  %v5904_v61 = vpack.c.bf16 %v114_v58, %v110_v57  ;;  %v115_v3 = vld [vmem:[%s6707_s3 + $0x30] sm:$0xff]  ;;  %v122_v5 = vld [vmem:[%s6707_s3 + $0x68] sm:$0xff]  ;;  %v120_v6 = vld [vmem:[%s6707_s3 + $0x58] sm:$0xff] }
  0x47   :  { %4629 = vmatpush1.bf16.msra.mxu0 %v5697_v48  ;;  %v124_v7 = vld [vmem:[%s6707_s3 + $0x78] sm:$0xff]  ;;  %v117_v11 = vld [vmem:[%s6707_s3 + $0x40] sm:$0xff]  ;;  %v123_v15 = vld [vmem:[%s6707_s3 + $0x70] sm:$0xff] }
  0x48   :  { %4637 = vmatpush1.bf16.msra.mxu1 %v5701_v49  ;;  %4639 = vmatprep.subr.bf16.mxu0 %v5653_v4  ;;  %v121_v12 = vld [vmem:[%s6707_s3 + $0x60] sm:$0xff]  ;;  %v5954_v14 = vpack.c.bf16 %v124_v7, %v120_v6  ;;  %v126_v16 = vld [vmem:[%s6707_s3 + $0x88] sm:$0xff]  ;;  %v132_v19 = vld [vmem:[%s6707_s3 + $0xb8] sm:$0xff] }
  0x49   :  { %4647 = vmatprep.subr.bf16.mxu1 %v5655_v8  ;;  %v5974_v20 = vpack.c.bf16 %v121_v12, %v117_v11  ;;  %v125_v23 = vld [vmem:[%s6707_s3 + $0x80] sm:$0xff]  ;;  %v131_v27 = vld [vmem:[%s6707_s3 + $0xb0] sm:$0xff]  ;;  %v134_v28 = vld [vmem:[%s6707_s3 + $0xc8] sm:$0xff] }
  0x4a   :  { %4455 = vmatmul.mubr.msk.f32.vlgmr.msra.gmra.mrb[2].mxu0 %vm218_vm0, %v217_v26  ;;  %v129_v24 = vld [vmem:[%s6707_s3 + $0xa0] sm:$0xff]  ;;  %v138_v29 = vld [vmem:[%s6707_s3 + $0xe8] sm:$0xff]  ;;  %v135_v37 = vld [vmem:[%s6707_s3 + $0xd0] sm:$0xff] }
  0x4b   :  { %4456 = vmatmul.mubr.msk.f32.vlgmr.msra.gmra.mrb[2].mxu1 %vm218_vm0, %v217_v26  ;;  %4641 = vmatpush1.bf16.msra.mxu0 %v5657_v9  ;;  %v6012_v32 = vpack.c.bf16 %v129_v24, %v125_v23  ;;  %v6018_v34 = vpack.c.bf16 %v138_v29, %v134_v28  ;;  %v137_v36 = vld [vmem:[%s6707_s3 + $0xe0] sm:$0xff]  ;;  %v146_v41 = vld [vmem:[%s6707_s3 + $0x128] sm:$0xff]  ;;  %v144_v42 = vld [vmem:[%s6707_s3 + $0x118] sm:$0xff] }
  0x4c   :  { %4649 = vmatpush1.bf16.msra.mxu1 %v5660_v13  ;;  %4643 = vmatprep.subr.bf16.mxu0 %v5664_v17  ;;  %v148_v43 = vld [vmem:[%s6707_s3 + $0x138] sm:$0xff]  ;;  %v141_v47 = vld [vmem:[%s6707_s3 + $0x100] sm:$0xff]  ;;  %v170_v23 = vld [vmem:[%s6707_s3 + $0x1e8] sm:$0xff] }
  0x4d   :  { %4651 = vmatprep.subr.bf16.mxu1 %v5666_v18  ;;  %621 = vmatprep.mubr.f32.mxu0 %v6716_v0  ;;  %v149_v59 = vld [vmem:[%s6707_s3 + $0x140] sm:$0xff]  ;;  %v164_v6 = vld [vmem:[%s6707_s3 + $0x1b8] sm:$0xff] }
  0x4e   :  { %692 = vmatprep.mubr.f32.mxu1 %v6716_v0  ;;  %v153_v60 = vld [vmem:[%s6707_s3 + $0x160] sm:$0xff]  ;;  %v168_v24 = vld [vmem:[%s6707_s3 + $0x1d8] sm:$0xff] }
  0x4f   :  { %4645 = vmatpush1.bf16.msra.mxu0 %v5669_v22  ;;  %v6120_v7 = vpack.c.bf16 %v153_v60, %v149_v59 }
  0x50   :  { %4653 = vmatpush1.bf16.msra.mxu1 %v5673_v25  ;;  %4655 = vmatprep.subr.bf16.mxu0 %v5678_v30 }
  0x51   :  { %4663 = vmatprep.subr.bf16.mxu1 %v5680_v31 }
  0x52   :  { %4458 = vmatmul.mubr.msk.f32.vlgmr.msra.gmra.mrb[4].mxu0 %vm218_vm0, %v4457_v50 }
  0x53   :  { %4459 = vmatmul.mubr.msk.f32.vlgmr.msra.gmra.mrb[4].mxu1 %vm218_vm0, %v4457_v50  ;;  %4657 = vmatpush1.bf16.msra.mxu0 %v5683_v35 }
  0x54   :  { %4665 = vmatpush1.bf16.msra.mxu1 %v5687_v39  ;;  %4659 = vmatprep.subr.bf16.mxu0 %v5689_v40 }
  0x55   :  { %4667 = vmatprep.subr.bf16.mxu1 %v5692_v44  ;;  %787 = vmatprep.mubr.f32.mxu0 %v6716_v0 }
  0x56   :  { %858 = vmatprep.mubr.f32.mxu1 %v6716_v0 }
  0x57   :  { %4661 = vmatpush1.bf16.msra.mxu0 %v5697_v48 }
  0x58   :  { %4669 = vmatpush1.bf16.msra.mxu1 %v5701_v49  ;;  %4671 = vmatprep.subr.bf16.mxu0 %v5653_v4 }
  0x59   :  { %4679 = vmatprep.subr.bf16.mxu1 %v5655_v8 }
  0x5a   :  { %4460 = vmatmul.mubr.msk.f32.vlgmr.msra.gmra.mrb[6].mxu0 %vm218_vm0, %v4457_v50 }
  0x5b   :  { %4461 = vmatmul.mubr.msk.f32.vlgmr.msra.gmra.mrb[6].mxu1 %vm218_vm0, %v4457_v50  ;;  %4673 = vmatpush1.bf16.msra.mxu0 %v5657_v9  ;;  %v6066_v50 = vpack.c.bf16 %v148_v43, %v144_v42 }
  0x5c   :  { %4681 = vmatpush1.bf16.msra.mxu1 %v5660_v13  ;;  %4675 = vmatprep.subr.bf16.mxu0 %v5664_v17 }
  0x5d   :  { %4683 = vmatprep.subr.bf16.mxu1 %v5666_v18  ;;  %958 = vmatprep.mubr.f32.mxu0 %v6716_v0 }
  0x5e   :  { %1029 = vmatprep.mubr.f32.mxu1 %v6716_v0 }
  0x5f   :  { %4677 = vmatpush1.bf16.msra.mxu0 %v5669_v22 }
  0x60   :  { %4685 = vmatpush1.bf16.msra.mxu1 %v5673_v25  ;;  %4687 = vmatprep.subr.bf16.mxu0 %v5678_v30 }
  0x61   :  { %4695 = vmatprep.subr.bf16.mxu1 %v5680_v31 }
  0x62   :  { %4463 = vmatmul.mubr.msk.f32.vlgmr.msra.gmra.mrb[8].mxu0 %vm218_vm0, %v4462_v51 }
  0x63   :  { %4464 = vmatmul.mubr.msk.f32.vlgmr.msra.gmra.mrb[8].mxu1 %vm218_vm0, %v4462_v51  ;;  %4689 = vmatpush1.bf16.msra.mxu0 %v5683_v35 }
  0x64   :  { %4697 = vmatpush1.bf16.msra.mxu1 %v5687_v39  ;;  %4691 = vmatprep.subr.bf16.mxu0 %v5689_v40 }
  0x65   :  { %4699 = vmatprep.subr.bf16.mxu1 %v5692_v44  ;;  %1124 = vmatprep.mubr.f32.mxu0 %v6716_v0 }
  0x66   :  { %1195 = vmatprep.mubr.f32.mxu1 %v6716_v0 }
  0x67   :  { %4693 = vmatpush1.bf16.msra.mxu0 %v5697_v48 }
  0x68   :  { %4701 = vmatpush1.bf16.msra.mxu1 %v5701_v49  ;;  %4703 = vmatprep.subr.bf16.mxu0 %v5653_v4 }
  0x69   :  { %4711 = vmatprep.subr.bf16.mxu1 %v5655_v8 }
  0x6a   :  { %4465 = vmatmul.mubr.msk.f32.vlgmr.msra.gmra.mrb[10].mxu0 %vm218_vm0, %v4462_v51 }
  0x6b   :  { %4466 = vmatmul.mubr.msk.f32.vlgmr.msra.gmra.mrb[10].mxu1 %vm218_vm0, %v4462_v51  ;;  %4705 = vmatpush1.bf16.msra.mxu0 %v5657_v9  ;;  %v147_v51 = vld [vmem:[%s6707_s3 + $0x130] sm:$0xff] }
  0x6c   :  { %4713 = vmatpush1.bf16.msra.mxu1 %v5660_v13  ;;  %4707 = vmatprep.subr.bf16.mxu0 %v5664_v17 }
  0x6d   :  { %4715 = vmatprep.subr.bf16.mxu1 %v5666_v18  ;;  %1295 = vmatprep.mubr.f32.mxu0 %v6716_v0 }
  0x6e   :  { %1366 = vmatprep.mubr.f32.mxu1 %v6716_v0 }
  0x6f   :  { %4709 = vmatpush1.bf16.msra.mxu0 %v5669_v22 }
  0x70   :  { %4717 = vmatpush1.bf16.msra.mxu1 %v5673_v25  ;;  %4719 = vmatprep.subr.bf16.mxu0 %v5678_v30 }
  0x71   :  { %4727 = vmatprep.subr.bf16.mxu1 %v5680_v31 }
  0x72   :  { %4468 = vmatmul.mubr.msk.f32.vlgmr.msra.gmra.mrb[12].mxu0 %vm218_vm0, %v4467_v52 }
  0x73   :  { %4469 = vmatmul.mubr.msk.f32.vlgmr.msra.gmra.mrb[12].mxu1 %vm218_vm0, %v4467_v52  ;;  %4721 = vmatpush1.bf16.msra.mxu0 %v5683_v35 }
  0x74   :  { %4729 = vmatpush1.bf16.msra.mxu1 %v5687_v39  ;;  %4723 = vmatprep.subr.bf16.mxu0 %v5689_v40 }
  0x75   :  { %4731 = vmatprep.subr.bf16.mxu1 %v5692_v44  ;;  %1461 = vmatprep.mubr.f32.mxu0 %v6716_v0 }
  0x76   :  { %1532 = vmatprep.mubr.f32.mxu1 %v6716_v0 }
  0x77   :  { %4725 = vmatpush1.bf16.msra.mxu0 %v5697_v48 }
  0x78   :  { %4733 = vmatpush1.bf16.msra.mxu1 %v5701_v49  ;;  %4735 = vmatprep.subr.bf16.mxu0 %v5653_v4 }
  0x79   :  { %4743 = vmatprep.subr.bf16.mxu1 %v5655_v8 }
  0x7a   :  { %4470 = vmatmul.mubr.msk.f32.vlgmr.msra.gmra.mrb[14].mxu0 %vm218_vm0, %v4467_v52 }
  0x7b   :  { %4471 = vmatmul.mubr.msk.f32.vlgmr.msra.gmra.mrb[14].mxu1 %vm218_vm0, %v4467_v52  ;;  %4737 = vmatpush1.bf16.msra.mxu0 %v5657_v9  ;;  %v150_v52 = vld [vmem:[%s6707_s3 + $0x148] sm:$0xff] }
  0x7c   :  { %4745 = vmatpush1.bf16.msra.mxu1 %v5660_v13  ;;  %4739 = vmatprep.subr.bf16.mxu0 %v5664_v17 }
  0x7d   :  { %4747 = vmatprep.subr.bf16.mxu1 %v5666_v18  ;;  %1632 = vmatprep.mubr.f32.mxu0 %v6716_v0 }
  0x7e   :  { %1703 = vmatprep.mubr.f32.mxu1 %v6716_v0 }
  0x7f   :  { %4741 = vmatpush1.bf16.msra.mxu0 %v5669_v22 }
  0x80   :  { %4749 = vmatpush1.bf16.msra.mxu1 %v5673_v25  ;;  %4751 = vmatprep.subr.bf16.mxu0 %v5678_v30 }
  0x81   :  { %4759 = vmatprep.subr.bf16.mxu1 %v5680_v31 }
  0x82   :  { %4473 = vmatmul.mubr.msk.f32.vlgmr.msra.gmra.mrb[16].mxu0 %vm218_vm0, %v4472_v53 }
  0x83   :  { %4474 = vmatmul.mubr.msk.f32.vlgmr.msra.gmra.mrb[16].mxu1 %vm218_vm0, %v4472_v53  ;;  %4753 = vmatpush1.bf16.msra.mxu0 %v5683_v35 }
  0x84   :  { %4761 = vmatpush1.bf16.msra.mxu1 %v5687_v39  ;;  %4755 = vmatprep.subr.bf16.mxu0 %v5689_v40 }
  0x85   :  { %4763 = vmatprep.subr.bf16.mxu1 %v5692_v44  ;;  %1798 = vmatprep.mubr.f32.mxu0 %v6716_v0 }
  0x86   :  { %1869 = vmatprep.mubr.f32.mxu1 %v6716_v0 }
  0x87   :  { %4757 = vmatpush1.bf16.msra.mxu0 %v5697_v48 }
  0x88   :  { %4765 = vmatpush1.bf16.msra.mxu1 %v5701_v49  ;;  %4767 = vmatprep.subr.bf16.mxu0 %v5653_v4 }
  0x89   :  { %4775 = vmatprep.subr.bf16.mxu1 %v5655_v8 }
  0x8a   :  { %4475 = vmatmul.mubr.msk.f32.vlgmr.msra.gmra.mrb[18].mxu0 %vm218_vm0, %v4472_v53 }
  0x8b   :  { %4476 = vmatmul.mubr.msk.f32.vlgmr.msra.gmra.mrb[18].mxu1 %vm218_vm0, %v4472_v53  ;;  %4769 = vmatpush1.bf16.msra.mxu0 %v5657_v9  ;;  %v154_v53 = vld [vmem:[%s6707_s3 + $0x168] sm:$0xff] }
  0x8c   :  { %4777 = vmatpush1.bf16.msra.mxu1 %v5660_v13  ;;  %4771 = vmatprep.subr.bf16.mxu0 %v5664_v17  ;;  %v6090_v58 = vpack.c.bf16 %v154_v53, %v150_v52 }
  0x8d   :  { %4779 = vmatprep.subr.bf16.mxu1 %v5666_v18  ;;  %1969 = vmatprep.mubr.f32.mxu0 %v6716_v0 }
  0x8e   :  { %2040 = vmatprep.mubr.f32.mxu1 %v6716_v0 }
  0x8f   :  { %4773 = vmatpush1.bf16.msra.mxu0 %v5669_v22 }
  0x90   :  { %4781 = vmatpush1.bf16.msra.mxu1 %v5673_v25  ;;  %4783 = vmatprep.subr.bf16.mxu0 %v5678_v30 }
  0x91   :  { %4791 = vmatprep.subr.bf16.mxu1 %v5680_v31 }
  0x92   :  { %4478 = vmatmul.mubr.msk.f32.vlgmr.msra.gmra.mrb[20].mxu0 %vm218_vm0, %v4477_v54 }
  0x93   :  { %4479 = vmatmul.mubr.msk.f32.vlgmr.msra.gmra.mrb[20].mxu1 %vm218_vm0, %v4477_v54  ;;  %4785 = vmatpush1.bf16.msra.mxu0 %v5683_v35 }
  0x94   :  { %4793 = vmatpush1.bf16.msra.mxu1 %v5687_v39  ;;  %4787 = vmatprep.subr.bf16.mxu0 %v5689_v40 }
  0x95   :  { %4795 = vmatprep.subr.bf16.mxu1 %v5692_v44  ;;  %2135 = vmatprep.mubr.f32.mxu0 %v6716_v0 }
  0x96   :  { %2206 = vmatprep.mubr.f32.mxu1 %v6716_v0 }
  0x97   :  { %4789 = vmatpush1.bf16.msra.mxu0 %v5697_v48 }
  0x98   :  { %4797 = vmatpush1.bf16.msra.mxu1 %v5701_v49  ;;  %4799 = vmatprep.subr.bf16.mxu0 %v5653_v4 }
  0x99   :  { %4807 = vmatprep.subr.bf16.mxu1 %v5655_v8 }
  0x9a   :  { %4480 = vmatmul.mubr.msk.f32.vlgmr.msra.gmra.mrb[22].mxu0 %vm218_vm0, %v4477_v54 }
  0x9b   :  { %4481 = vmatmul.mubr.msk.f32.vlgmr.msra.gmra.mrb[22].mxu1 %vm218_vm0, %v4477_v54  ;;  %4801 = vmatpush1.bf16.msra.mxu0 %v5657_v9  ;;  %v152_v54 = vld [vmem:[%s6707_s3 + $0x158] sm:$0xff] }
  0x9c   :  { %4809 = vmatpush1.bf16.msra.mxu1 %v5660_v13  ;;  %4803 = vmatprep.subr.bf16.mxu0 %v5664_v17 }
  0x9d   :  { %4811 = vmatprep.subr.bf16.mxu1 %v5666_v18  ;;  %2306 = vmatprep.mubr.f32.mxu0 %v6716_v0 }
  0x9e   :  { %2377 = vmatprep.mubr.f32.mxu1 %v6716_v0 }
  0x9f   :  { %4805 = vmatpush1.bf16.msra.mxu0 %v5669_v22 }
  0xa0   :  { %4813 = vmatpush1.bf16.msra.mxu1 %v5673_v25  ;;  %4815 = vmatprep.subr.bf16.mxu0 %v5678_v30 }
  0xa1   :  { %4823 = vmatprep.subr.bf16.mxu1 %v5680_v31 }
  0xa2   :  { %4483 = vmatmul.mubr.msk.f32.vlgmr.msra.gmra.mrb[24].mxu0 %vm218_vm0, %v4482_v55 }
  0xa3   :  { %4484 = vmatmul.mubr.msk.f32.vlgmr.msra.gmra.mrb[24].mxu1 %vm218_vm0, %v4482_v55  ;;  %4817 = vmatpush1.bf16.msra.mxu0 %v5683_v35 }
  0xa4   :  { %4825 = vmatpush1.bf16.msra.mxu1 %v5687_v39  ;;  %4819 = vmatprep.subr.bf16.mxu0 %v5689_v40 }
  0xa5   :  { %4827 = vmatprep.subr.bf16.mxu1 %v5692_v44  ;;  %2472 = vmatprep.mubr.f32.mxu0 %v6716_v0 }
  0xa6   :  { %2543 = vmatprep.mubr.f32.mxu1 %v6716_v0 }
  0xa7   :  { %4821 = vmatpush1.bf16.msra.mxu0 %v5697_v48 }
  0xa8   :  { %4829 = vmatpush1.bf16.msra.mxu1 %v5701_v49  ;;  %4831 = vmatprep.subr.bf16.mxu0 %v5653_v4  ;;  %v118_v4 = vld [vmem:[%s6707_s3 + $0x48] sm:$0xff] }
  0xa9   :  { %4839 = vmatprep.subr.bf16.mxu1 %v5655_v8  ;;  %v5936_v8 = vpack.c.bf16 %v113_v63, %v109_v62  ;;  %v5942_v10 = vpack.c.bf16 %v122_v5, %v118_v4  ;;  %v151_v62 = vld [vmem:[%s6707_s3 + $0x150] sm:$0xff]  ;;  %v162_v4 = vld [vmem:[%s6707_s3 + $0x1a8] sm:$0xff]  ;;  %v160_v5 = vld [vmem:[%s6707_s3 + $0x198] sm:$0xff] }
  0xaa   :  { %4485 = vmatmul.mubr.msk.f32.vlgmr.msra.gmra.mrb[26].mxu0 %vm218_vm0, %v4482_v55 }
  0xab   :  { %4486 = vmatmul.mubr.msk.f32.vlgmr.msra.gmra.mrb[26].mxu1 %vm218_vm0, %v4482_v55  ;;  %4833 = vmatpush1.bf16.msra.mxu0 %v5657_v9  ;;  %v5940_v9 = vpack.c.bf16 %v115_v3, %v111_v1  ;;  %v156_v55 = vld [vmem:[%s6707_s3 + $0x178] sm:$0xff]  ;;  %v155_v1 = vld [vmem:[%s6707_s3 + $0x170] sm:$0xff]  ;;  %v158_v3 = vld [vmem:[%s6707_s3 + $0x188] sm:$0xff] }
  0xac   :  { %4841 = vmatpush1.bf16.msra.mxu1 %v5660_v13  ;;  %4835 = vmatprep.subr.bf16.mxu0 %v5664_v17  ;;  %v119_v13 = vld [vmem:[%s6707_s3 + $0x50] sm:$0xff]  ;;  %v130_v17 = vld [vmem:[%s6707_s3 + $0xa8] sm:$0xff]  ;;  %v6102_v63 = vpack.c.bf16 %v156_v55, %v152_v54  ;;  %v6124_v11 = vpack.c.bf16 %v155_v1, %v151_v62  ;;  %v6126_v12 = vpack.c.bf16 %v162_v4, %v158_v3 }
  0xad   :  { %4843 = vmatprep.subr.bf16.mxu1 %v5666_v18  ;;  %2643 = vmatprep.mubr.f32.mxu0 %v6716_v0  ;;  %v128_v18 = vld [vmem:[%s6707_s3 + $0x98] sm:$0xff]  ;;  %v5978_v21 = vpack.c.bf16 %v123_v15, %v119_v13  ;;  %v157_v13 = vld [vmem:[%s6707_s3 + $0x180] sm:$0xff] }
  0xae   :  { %2714 = vmatprep.mubr.f32.mxu1 %v6716_v0  ;;  %v5992_v26 = vpack.c.bf16 %v132_v19, %v128_v18  ;;  %v161_v15 = vld [vmem:[%s6707_s3 + $0x1a0] sm:$0xff]  ;;  %v163_v18 = vld [vmem:[%s6707_s3 + $0x1b0] sm:$0xff]  ;;  %v166_v19 = vld [vmem:[%s6707_s3 + $0x1c8] sm:$0xff] }
  0xaf   :  { %4837 = vmatpush1.bf16.msra.mxu0 %v5669_v22  ;;  %v5980_v22 = vpack.c.bf16 %v130_v17, %v126_v16  ;;  %v159_v16 = vld [vmem:[%s6707_s3 + $0x190] sm:$0xff]  ;;  %v6138_v17 = vpack.c.bf16 %v164_v6, %v160_v5  ;;  %v6162_v29 = vpack.c.bf16 %v170_v23, %v166_v19 }
  0xb0   :  { %4845 = vmatpush1.bf16.msra.mxu1 %v5673_v25  ;;  %4847 = vmatprep.subr.bf16.mxu0 %v5678_v30  ;;  %v127_v25 = vld [vmem:[%s6707_s3 + $0x90] sm:$0xff]  ;;  %v136_v30 = vld [vmem:[%s6707_s3 + $0xd8] sm:$0xff]  ;;  %v6160_v28 = vpack.c.bf16 %v163_v18, %v159_v16 }
  0xb1   :  { %4855 = vmatprep.subr.bf16.mxu1 %v5680_v31  ;;  %v140_v31 = vld [vmem:[%s6707_s3 + $0xf8] sm:$0xff]  ;;  %v6016_v33 = vpack.c.bf16 %v131_v27, %v127_v25  ;;  %v6156_v27 = vpack.c.bf16 %v161_v15, %v157_v13 }
  0xb2   :  { %4488 = vmatmul.mubr.msk.f32.vlgmr.msra.gmra.mrb[28].mxu0 %vm218_vm0, %v4487_v56  ;;  %v6030_v38 = vpack.c.bf16 %v140_v31, %v136_v30  ;;  %v172_v25 = vld [vmem:[%s6707_s3 + $0x1f8] sm:$0xff]  ;;  %v165_v30 = vld [vmem:[%s6707_s3 + $0x1c0] sm:$0xff] }
  0xb3   :  { %4489 = vmatmul.mubr.msk.f32.vlgmr.msra.gmra.mrb[28].mxu1 %vm218_vm0, %v4487_v56  ;;  %4849 = vmatpush1.bf16.msra.mxu0 %v5683_v35  ;;  %v133_v35 = vld [vmem:[%s6707_s3 + $0xc0] sm:$0xff] }
  0xb4   :  { %4857 = vmatpush1.bf16.msra.mxu1 %v5687_v39  ;;  %4851 = vmatprep.subr.bf16.mxu0 %v5689_v40  ;;  %v139_v39 = vld [vmem:[%s6707_s3 + $0xf0] sm:$0xff]  ;;  %v142_v40 = vld [vmem:[%s6707_s3 + $0x108] sm:$0xff]  ;;  %v169_v31 = vld [vmem:[%s6707_s3 + $0x1e0] sm:$0xff] }
  0xb5   :  { %4859 = vmatprep.subr.bf16.mxu1 %v5692_v44  ;;  %2809 = vmatprep.mubr.f32.mxu0 %v6716_v0  ;;  %v6048_v44 = vpack.c.bf16 %v137_v36, %v133_v35  ;;  %v6052_v45 = vpack.c.bf16 %v139_v39, %v135_v37  ;;  %v6054_v46 = vpack.c.bf16 %v146_v41, %v142_v40  ;;  %v167_v36 = vld [vmem:[%s6707_s3 + $0x1d0] sm:$0xff]  ;;  %v175_v41 = vlaneseq }
  0xb6   :  { %2880 = vmatprep.mubr.f32.mxu1 %v6716_v0  ;;  %v6171_v35 = vpack.c.bf16 %v172_v25, %v168_v24  ;;  %v171_v37 = vld [vmem:[%s6707_s3 + $0x1f0] sm:$0xff]  ;;  %v6180_v39 = vpack.c.bf16 %v169_v31, %v165_v30 }
  0xb7   :  { %4853 = vmatpush1.bf16.msra.mxu0 %v5697_v48  ;;  %v145_v48 = vld [vmem:[%s6707_s3 + $0x120] sm:$0xff]  ;;  %v6184_v40 = vpack.c.bf16 %v171_v37, %v167_v36  ;;  %v6191_v42 = vshrl.u32 %v175_v41, 7 }
  0xb8   :  { %4861 = vmatpush1.bf16.msra.mxu1 %v5701_v49  ;;  %4863 = vmatprep.subr.bf16.mxu0 %v5904_v61  ;;  %v143_v49 = vld [vmem:[%s6707_s3 + $0x110] sm:$0xff] }
  0xb9   :  { %4895 = vmatprep.subr.bf16.mxu1 %v5917_v2  ;;  %v6088_v57 = vpack.c.bf16 %v147_v51, %v143_v49  ;;  %v6720_v43 = vsub.s32 0, %v6191_v42  ;;  %v6719_v51 = vsub.s32 2, %v6191_v42  ;;  %v6718_v52 = vsub.s32 1, %v6191_v42 }
  0xba   :  { %4490 = vmatmul.mubr.msk.f32.vlgmr.msra.gmra.mrb[30].mxu0 %vm218_vm0, %v4487_v56  ;;  %v6715_v53 = vsub.s32 3, %v6191_v42 }
  0xbb   :  { %4491 = vmatmul.mubr.msk.f32.vlgmr.msra.gmra.mrb[30].mxu1 %vm218_vm0, %v4487_v56  ;;  %4865 = vmatpush1.bf16.msra.mxu0 %v5936_v8  ;;  %v6084_v56 = vpack.c.bf16 %v145_v48, %v141_v47  ;;  %v173_v47 = vld [vmem:[%s6709_s5] sm:$0xf]  ;;  %v5540_v48 = vmov 1983009808  }
  0xbc   :  { %4897 = vmatpush1.bf16.msra.mxu1 %v5940_v9  ;;  %4867 = vmatprep.subr.bf16.mxu0 %v5942_v10  ;;  %v371_v49 = vunpack.c.l.s4 %v5540_v48  ;;  %v6202_v54 = vrot.slane %v173_v47, %v6720_v43  ;;  %v6206_v59 = vrot.slane %v173_v47, %v6719_v51  ;;  %v6210_v60 = vrot.slane %v173_v47, %v6718_v52 }
  0xbd   :  { %4899 = vmatprep.subr.bf16.mxu1 %v5954_v14  ;;  %3018 = vmatprep.mubr.f32.mxu0 %v6716_v0  ;;  %v6214_v62 = vrot.slane %v173_v47, %v6715_v53 }
  0xbe   :  { %3089 = vmatprep.mubr.f32.mxu1 %v6716_v0  ;;  %v372_v55 = vunpack.c.0.s8 %v371_v49 }
  0xbf   :  { %4869 = vmatpush1.bf16.msra.mxu0 %v5974_v20 }
  0xc0   :  { %4901 = vmatpush1.bf16.msra.mxu1 %v5978_v21  ;;  %4871 = vmatprep.subr.bf16.mxu0 %v5980_v22  ;;  %v6218_v6 = vsub.s32 %v372_v55, %v6191_v42 }
  0xc1   :  { %4903 = vmatprep.subr.bf16.mxu1 %v5992_v26 }
  0xc3   :  { %4873 = vmatpush1.bf16.msra.mxu0 %v6012_v32 }
  0xc4   :  { %4905 = vmatpush1.bf16.msra.mxu1 %v6016_v33  ;;  %4875 = vmatprep.subr.bf16.mxu0 %v6018_v34 }
  0xc5   :  { %4907 = vmatprep.subr.bf16.mxu1 %v6030_v38 }
  0xc7   :  { %4877 = vmatpush1.bf16.msra.mxu0 %v6048_v44 }
  0xc8   :  { %4909 = vmatpush1.bf16.msra.mxu1 %v6052_v45  ;;  %4879 = vmatprep.subr.bf16.mxu0 %v6054_v46 }
  0xc9   :  { %4911 = vmatprep.subr.bf16.mxu1 %v6066_v50 }
  0xcb   :  { %4881 = vmatpush1.bf16.msra.mxu0 %v6084_v56 }
  0xcc   :  { %4913 = vmatpush1.bf16.msra.mxu1 %v6088_v57  ;;  %4883 = vmatprep.subr.bf16.mxu0 %v6090_v58 }
  0xcd   :  { %4915 = vmatprep.subr.bf16.mxu1 %v6102_v63 }
  0xcf   :  { %4885 = vmatpush1.bf16.msra.mxu0 %v6120_v7 }
  0xd0   :  { %4917 = vmatpush1.bf16.msra.mxu1 %v6124_v11  ;;  %4887 = vmatprep.subr.bf16.mxu0 %v6126_v12 }
  0xd1   :  { %4919 = vmatprep.subr.bf16.mxu1 %v6138_v17 }
  0xd3   :  { %4889 = vmatpush1.bf16.msra.mxu0 %v6156_v27 }
  0xd4   :  { %4921 = vmatpush1.bf16.msra.mxu1 %v6160_v28  ;;  %4891 = vmatprep.subr.bf16.mxu0 %v6162_v29 }
  0xd5   :  { %4923 = vmatprep.subr.bf16.mxu1 %v6171_v35 }
  0xd7   :  { %4893 = vmatpush1.bf16.msra.mxu0 %v6180_v39 }
  0xd8   :  { %4925 = vmatpush1.bf16.msra.mxu1 %v6184_v40  ;;  %4927 = vmatprep.subr.bf16.mxu0 %v5904_v61 }
  0xd9   :  { %4959 = vmatprep.subr.bf16.mxu1 %v5917_v2 }
 0x115   :  { %v288_v1 = vpop.f32.mrb[0].mxu0 }
 0x116   :  { %v289_v3 = vadd.f32 %v288_v1, %v6202_v54  ;;  %v359_v4 = vpop.f32.mrb[0].mxu1  ;;  %v290_v5 = vpop.f32.mrb[1].mxu0 }
 0x117   :  { %v360_v13 = vadd.f32 %v359_v4, %v6206_v59  ;;  %v291_v15 = vadd.f32 %v290_v5, %v6210_v60  ;;  %v361_v16 = vpop.f32.mrb[1].mxu1 }
 0x118   :  { %v362_v18 = vadd.f32 %v361_v16, %v6214_v62 }
 0x119   :  { %v368_v19 = vcombine.low %v289_v3, %v291_v15 }
 0x11a   :  { %v369_v23 = vcombine.low %v360_v13, %v362_v18 }
 0x11b   :  { %v376_v24 = vrot.slane %v368_v19, %v6218_v6 }
 0x11c   :  { %v383_v25 = vrot.slane %v369_v23, %v6218_v6 }
 0x11d   :  { %v453_v30 = vpop.f32.mrb[2].mxu0 }
 0x11e   :  { %v384_v31 = vcombine.low %v376_v24, %v383_v25  ;;  %v524_v36 = vpop.f32.mrb[2].mxu1  ;;  %v455_v37 = vpop.f32.mrb[3].mxu0 }
 0x11f   :  { %v526_v41 = vpop.f32.mrb[3].mxu1 }
 0x120   :  { %v4492_v47 = vmul.f32 -1.442695, %v384_v31  ;;  %v2919_v25 = vrot.slane %v384_v31, 6 }
 0x122   :  { %5368 = vpow2.f32 %v4492_v47 }
 0x125   :  { %v623_v48 = vpop.f32.mrb[4].mxu0 }
 0x126   :  { %v624_v49 = vadd.f32 %v623_v48, %v6202_v54  ;;  %v694_v55 = vpop.f32.mrb[4].mxu1  ;;  %v625_v1 = vpop.f32.mrb[5].mxu0 }
 0x127   :  { %v695_v4 = vadd.f32 %v694_v55, %v6206_v59  ;;  %v626_v3 = vadd.f32 %v625_v1, %v6210_v60  ;;  %v696_v5 = vpop.f32.mrb[5].mxu1 }
 0x128   :  { %v697_v13 = vadd.f32 %v696_v5, %v6214_v62 }
 0x129   :  { %v703_v15 = vcombine.low %v624_v49, %v626_v3 }
 0x12a   :  { %v704_v16 = vcombine.low %v695_v4, %v697_v13 }
 0x12b   :  { %v6230_v18 = vrot.slane %v703_v15, %v6218_v6 }
 0x12c   :  { %v5369_v19 = vpop.eup %5368  ;;  %v6233_v23 = vrot.slane %v704_v16, %v6218_v6 }
 0x12d   :  { %v2915_v24 = vadd.f32 1.0, %v5369_v19  ;;  %v789_v30 = vpop.f32.mrb[6].mxu0 }
 0x12e   :  { %v860_v37 = vpop.f32.mrb[6].mxu1  ;;  %v791_v41 = vpop.f32.mrb[7].mxu0 }
 0x12f   :  { %5370 = vrcp.f32 %v2915_v24  ;;  %v862_v47 = vpop.f32.mrb[7].mxu1 }
 0x130   :  { %5372 = vtanh.f32 %v2919_v25 }
 0x135   :  { %v960_v48 = vpop.f32.mrb[8].mxu0 }
 0x136   :  { %v961_v49 = vadd.f32 %v960_v48, %v6202_v54  ;;  %v1031_v55 = vpop.f32.mrb[8].mxu1  ;;  %v962_v1 = vpop.f32.mrb[9].mxu0 }
 0x137   :  { %v1032_v4 = vadd.f32 %v1031_v55, %v6206_v59  ;;  %v963_v3 = vadd.f32 %v962_v1, %v6210_v60  ;;  %v1033_v5 = vpop.f32.mrb[9].mxu1 }
 0x138   :  { %v1034_v31 = vadd.f32 %v1033_v5, %v6214_v62 }
 0x139   :  { %v5371_v13 = vpop.eup %5370  ;;  %v1040_v15 = vcombine.low %v961_v49, %v963_v3 }
 0x13a   :  { %v2923_v16 = vrot.slane %v5371_v13, 2  ;;  %v1041_v19 = vcombine.low %v1032_v4, %v1034_v31  ;;  %v5373_v30 = vpop.eup %5372 }
 0x13b   :  { %v6242_v24 = vrot.slane %v1040_v15, %v6218_v6  ;;  %v2926_v25 = vmul.f32 %v5373_v30, %v5371_v13 }
 0x13c   :  { %v2925_v37 = vmul.f32 0.0, %v2923_v16  ;;  %v6245_v41 = vrot.slane %v1041_v19, %v6218_v6 }
 0x13d   :  { %v1126_v47 = vpop.f32.mrb[10].mxu0 }
 0x13e   :  { %v6247_v48 = vadd.f32 %v2926_v25, %v2925_v37  ;;  %v1197_v1 = vpop.f32.mrb[10].mxu1  ;;  %v1128_v5 = vpop.f32.mrb[11].mxu0  ;;  %v2929_v37 = vrot.slane %v5371_v13, 4 }
 0x13f   :  { %v1199_v49 = vpop.f32.mrb[11].mxu1 }
 0x140   :  { %5374 = vtanh.f32 %v6247_v48 }
 0x145   :  { %v1297_v4 = vpop.f32.mrb[12].mxu0 }
 0x146   :  { %v1298_v3 = vadd.f32 %v1297_v4, %v6202_v54  ;;  %v1368_v31 = vpop.f32.mrb[12].mxu1  ;;  %v1299_v15 = vpop.f32.mrb[13].mxu0 }
 0x147   :  { %v1369_v16 = vadd.f32 %v1368_v31, %v6206_v59  ;;  %v1300_v19 = vadd.f32 %v1299_v15, %v6210_v60  ;;  %v1370_v30 = vpop.f32.mrb[13].mxu1 }
 0x148   :  { %v1371_v25 = vadd.f32 %v1370_v30, %v6214_v62 }
 0x149   :  { %v1377_v47 = vcombine.low %v1298_v3, %v1300_v19 }
 0x14a   :  { %v5375_v55 = vpop.eup %5374  ;;  %v1378_v1 = vcombine.low %v1369_v16, %v1371_v25 }
 0x14b   :  { %v2931_v5 = vmul.f32 %v5375_v55, %v2929_v37  ;;  %v6257_v49 = vrot.slane %v1377_v47, %v6218_v6 }
 0x14c   :  { %v6260_v36 = vrot.slane %v1378_v1, %v6218_v6 }
 0x14d   :  { %3019 = vmatmul.mubr.f32.vlgmr.msra.gmra.mrb[32].mxu0 %v2931_v5  ;;  %3090 = vmatmul.mubr.f32.vlgmr.msra.gmra.mrb[32].mxu1 %v2931_v5  ;;  %v1463_v4 = vpop.f32.mrb[14].mxu0 }
 0x14e   :  { %v1534_v15 = vpop.f32.mrb[14].mxu1  ;;  %v1465_v53 = vpop.f32.mrb[15].mxu0  ;;  %4929 = vmatpush1.bf16.msra.mxu0 %v5936_v8  ;;  %4961 = vmatpush1.bf16.msra.mxu1 %v5940_v9 }
 0x14f   :  { %v1536_v13 = vpop.f32.mrb[15].mxu1  ;;  %4931 = vmatprep.subr.bf16.mxu0 %v5942_v10  ;;  %4963 = vmatprep.subr.bf16.mxu1 %v5954_v14 }
 0x150   :  { %3204 = vmatprep.mubr.f32.mxu0 %v6716_v0  ;;  %3275 = vmatprep.mubr.f32.mxu1 %v6716_v0 }
 0x152   :  { %4933 = vmatpush1.bf16.msra.mxu0 %v5974_v20  ;;  %4965 = vmatpush1.bf16.msra.mxu1 %v5978_v21 }
 0x153   :  { %4935 = vmatprep.subr.bf16.mxu0 %v5980_v22  ;;  %4967 = vmatprep.subr.bf16.mxu1 %v5992_v26 }
 0x155   :  { %v1634_v53 = vpop.f32.mrb[16].mxu0 }
 0x156   :  { %v1635_v55 = vadd.f32 %v1634_v53, %v6202_v54  ;;  %v1705_v3 = vpop.f32.mrb[16].mxu1  ;;  %v1636_v16 = vpop.f32.mrb[17].mxu0  ;;  %4937 = vmatpush1.bf16.msra.mxu0 %v6012_v32  ;;  %4969 = vmatpush1.bf16.msra.mxu1 %v6016_v33 }
 0x157   :  { %v1706_v19 = vadd.f32 %v1705_v3, %v6206_v59  ;;  %v1637_v30 = vadd.f32 %v1636_v16, %v6210_v60  ;;  %v1707_v25 = vpop.f32.mrb[17].mxu1  ;;  %4939 = vmatprep.subr.bf16.mxu0 %v6018_v34  ;;  %4971 = vmatprep.subr.bf16.mxu1 %v6030_v38 }
 0x158   :  { %v1708_v37 = vadd.f32 %v1707_v25, %v6214_v62 }
 0x159   :  { %v1714_v47 = vcombine.low %v1635_v55, %v1637_v30 }
 0x15a   :  { %v1715_v1 = vcombine.low %v1706_v19, %v1708_v37  ;;  %4941 = vmatpush1.bf16.msra.mxu0 %v6048_v44  ;;  %4973 = vmatpush1.bf16.msra.mxu1 %v6052_v45 }
 0x15b   :  { %v6285_v5 = vrot.slane %v1714_v47, %v6218_v6  ;;  %4943 = vmatprep.subr.bf16.mxu0 %v6054_v46  ;;  %4975 = vmatprep.subr.bf16.mxu1 %v6066_v50 }
 0x15c   :  { %v6290_v4 = vrot.slane %v1715_v1, %v6218_v6 }
 0x15d   :  { %6727 = vst [vmem:[#allocation14_spill] sm:$0xff] %v6285_v5  ;;  %v1800_v15 = vpop.f32.mrb[18].mxu0 }
 0x15e   :  { %6728 = vst [vmem:[#allocation15_spill] sm:$0xff] %v6290_v4  ;;  %v1871_v53 = vpop.f32.mrb[18].mxu1  ;;  %v1802_v55 = vpop.f32.mrb[19].mxu0  ;;  %4945 = vmatpush1.bf16.msra.mxu0 %v6084_v56  ;;  %4977 = vmatpush1.bf16.msra.mxu1 %v6088_v57 }
 0x15f   :  { %v1873_v3 = vpop.f32.mrb[19].mxu1  ;;  %4947 = vmatprep.subr.bf16.mxu0 %v6090_v58  ;;  %4979 = vmatprep.subr.bf16.mxu1 %v6102_v63 }
 0x162   :  { %4949 = vmatpush1.bf16.msra.mxu0 %v6120_v7  ;;  %4981 = vmatpush1.bf16.msra.mxu1 %v6124_v11 }
 0x163   :  { %4951 = vmatprep.subr.bf16.mxu0 %v6126_v12  ;;  %4983 = vmatprep.subr.bf16.mxu1 %v6138_v17 }
 0x165   :  { %v1971_v16 = vpop.f32.mrb[20].mxu0 }
 0x166   :  { %v1972_v19 = vadd.f32 %v1971_v16, %v6202_v54  ;;  %v2042_v30 = vpop.f32.mrb[20].mxu1  ;;  %v1973_v25 = vpop.f32.mrb[21].mxu0  ;;  %4953 = vmatpush1.bf16.msra.mxu0 %v6156_v27  ;;  %4985 = vmatpush1.bf16.msra.mxu1 %v6160_v28 }
 0x167   :  { %v2043_v37 = vadd.f32 %v2042_v30, %v6206_v59  ;;  %v1974_v47 = vadd.f32 %v1973_v25, %v6210_v60  ;;  %v2044_v1 = vpop.f32.mrb[21].mxu1  ;;  %4955 = vmatprep.subr.bf16.mxu0 %v6162_v29  ;;  %4987 = vmatprep.subr.bf16.mxu1 %v6171_v35 }
 0x168   :  { %v2045_v15 = vadd.f32 %v2044_v1, %v6214_v62 }
 0x169   :  { %v2051_v53 = vcombine.low %v1972_v19, %v1974_v47 }
 0x16a   :  { %v2052_v55 = vcombine.low %v2043_v37, %v2045_v15  ;;  %4957 = vmatpush1.bf16.msra.mxu0 %v6180_v39  ;;  %4989 = vmatpush1.bf16.msra.mxu1 %v6184_v40 }
 0x16b   :  { %v6313_v3 = vrot.slane %v2051_v53, %v6218_v6  ;;  %4991 = vmatprep.subr.bf16.mxu0 %v5904_v61  ;;  %5023 = vmatprep.subr.bf16.mxu1 %v5917_v2 }
 0x16c   :  { %v6318_v16 = vrot.slane %v2052_v55, %v6218_v6 }
 0x16d   :  { %6729 = vst [vmem:[#allocation16_spill] sm:$0xff] %v6313_v3  ;;  %v2137_v30 = vpop.f32.mrb[22].mxu0 }
 0x16e   :  { %6730 = vst [vmem:[#allocation17_spill] sm:$0xff] %v6318_v16  ;;  %v2208_v19 = vpop.f32.mrb[22].mxu1  ;;  %v2139_v37 = vpop.f32.mrb[23].mxu0 }
 0x16f   :  { %v2210_v47 = vpop.f32.mrb[23].mxu1 }
 0x175   :  { %v2308_v1 = vpop.f32.mrb[24].mxu0 }
 0x176   :  { %v2309_v15 = vadd.f32 %v2308_v1, %v6202_v54  ;;  %v2379_v13 = vpop.f32.mrb[24].mxu1  ;;  %v2310_v53 = vpop.f32.mrb[25].mxu0 }
 0x177   :  { %v2380_v31 = vadd.f32 %v2379_v13, %v6206_v59  ;;  %v2311_v0 = vadd.f32 %v2310_v53, %v6210_v60  ;;  %v2381_v52 = vpop.f32.mrb[25].mxu1 }
 0x178   :  { %v2382_v55 = vadd.f32 %v2381_v52, %v6214_v62 }
 0x179   :  { %v2388_v51 = vcombine.low %v2309_v15, %v2311_v0  ;;  %v195_v15 = vld [vmem:[%s6710_s6] sm:$0xf] }
 0x17a   :  { %v2389_v30 = vcombine.low %v2380_v31, %v2382_v55 }
 0x17b   :  { %v6327_v43 = vrot.slane %v2388_v51, %v6218_v6 }
 0x17c   :  { %v6330_v19 = vrot.slane %v2389_v30, %v6218_v6 }
 0x17d   :  { %6731 = vst [vmem:[#allocation18_spill] sm:$0xff] %v6327_v43  ;;  %v2474_v37 = vpop.f32.mrb[26].mxu0 }
 0x17e   :  { %6732 = vst [vmem:[#allocation19_spill] sm:$0xff] %v6330_v19  ;;  %v2545_v1 = vpop.f32.mrb[26].mxu1  ;;  %v2476_v25 = vpop.f32.mrb[27].mxu0 }
 0x17f   :  { %v2547_v13 = vpop.f32.mrb[27].mxu1  ;;  %v6733_v25 = vsub.s32 0, %v6191_v42 }
 0x181   :  { %v200_v1 = vrot.slane %v195_v15, %v6733_v25 }
 0x185   :  { %v2645_v16 = vpop.f32.mrb[28].mxu0 }
 0x186   :  { %v2646_v53 = vadd.f32 %v2645_v16, %v6202_v54  ;;  %v2716_v3 = vpop.f32.mrb[28].mxu1  ;;  %v2647_v52 = vpop.f32.mrb[29].mxu0  ;;  %v6734_v16 = vsub.s32 2, %v6191_v42 }
 0x187   :  { %v2717_v0 = vadd.f32 %v2716_v3, %v6206_v59  ;;  %v2648_v51 = vadd.f32 %v2647_v52, %v6210_v60  ;;  %v2718_v31 = vpop.f32.mrb[29].mxu1  ;;  %v6735_v60 = vsub.s32 1, %v6191_v42  ;;  %v6736_v52 = vsub.s32 3, %v6191_v42 }
 0x188   :  { %v2719_v55 = vadd.f32 %v2718_v31, %v6214_v62  ;;  %v208_v59 = vrot.slane %v195_v15, %v6734_v16 }
 0x189   :  { %v2725_v30 = vcombine.low %v2646_v53, %v2648_v51  ;;  %v204_v3 = vrot.slane %v195_v15, %v6735_v60  ;;  %v212_v62 = vrot.slane %v195_v15, %v6736_v52 }
 0x18a   :  { %v2726_v37 = vcombine.low %v2717_v0, %v2719_v55 }
 0x18b   :  { %v6344_v54 = vrot.slane %v2725_v30, %v6218_v6 }
 0x18c   :  { %v6351_v13 = vrot.slane %v2726_v37, %v6218_v6 }
 0x18d   :  { %v2811_v53 = vpop.f32.mrb[30].mxu0 }
 0x18e   :  { %v2812_v51 = vadd.f32 %v2811_v53, %v200_v1  ;;  %v2882_v31 = vpop.f32.mrb[30].mxu1  ;;  %v2813_v55 = vpop.f32.mrb[31].mxu0 }
 0x18f   :  { %v2883_v30 = vadd.f32 %v2882_v31, %v208_v59  ;;  %v2814_v25 = vadd.f32 %v2813_v55, %v204_v3  ;;  %v2884_v47 = vpop.f32.mrb[31].mxu1 }
 0x190   :  { %v2885_v16 = vadd.f32 %v2884_v47, %v212_v62  ;;  %v6737_v47 = vcombine.low %v6230_v18, %v6233_v23  ;;  %v6738_v18 = vmov 0.0  }
 0x191   :  { %v2891_v19 = vcombine.low %v2812_v51, %v2814_v25 }
 0x192   :  { %v2892_v43 = vcombine.low %v2883_v30, %v2885_v16 }
 0x193   :  { %v2899_v60 = vrot.slane %v2891_v19, %v6218_v6 }
 0x194   :  { %v2906_v37 = vrot.slane %v2892_v43, %v6218_v6 }
 0x196   :  { %v6359_v4 = vcombine.low %v2899_v60, %v2906_v37 }
 0x220   :  { %v3020_v42 = vpop.f32.mrb[32].mxu0  ;;  %v3091_v15 = vpop.f32.mrb[32].mxu1 }
 0x221   :  { %v3022_v52 = vpop.f32.mrb[33].mxu0  ;;  %v3093_v5 = vpop.f32.mrb[33].mxu1 }
 0x222   :  { %v3100_v0 = vcombine.low %v3020_v42, %v3022_v52  ;;  %v3101_v1 = vcombine.low %v3091_v15, %v3093_v5 }
 0x224   :  { %v3108_v53 = vrot.slane %v3100_v0, %v6218_v6  ;;  %v3115_v59 = vrot.slane %v3101_v1, %v6218_v6 }
 0x226   :  { %v3116_v3 = vcombine.low %v3108_v53, %v3115_v59 }
 0x228   :  { %v3118_v62 = vadd.f32 %v3116_v3, %v6737_v47 }
 0x22a   :  { %v4494_v19 = vmul.f32 -1.442695, %v3118_v62  ;;  %v3126_v31 = vrot.slane %v3118_v62, 6  ;;  %v6739_v62 = vcombine.low %v6242_v24, %v6245_v41 }
 0x22c   :  { %5376 = vpow2.f32 %v4494_v19 }
 0x236   :  { %v5377_v43 = vpop.eup %5376 }
 0x237   :  { %v3122_v51 = vadd.f32 1.0, %v5377_v43 }
 0x239   :  { %5378 = vrcp.f32 %v3122_v51 }
 0x23a   :  { %5380 = vtanh.f32 %v3126_v31 }
 0x243   :  { %v5379_v55 = vpop.eup %5378 }
 0x244   :  { %v3130_v30 = vrot.slane %v5379_v55, 2  ;;  %v5381_v25 = vpop.eup %5380  ;;  %v3136_v60 = vrot.slane %v5379_v55, 4 }
 0x245   :  { %v3133_v5 = vmul.f32 %v5381_v25, %v5379_v55 }
 0x246   :  { %v3132_v0 = vmul.f32 %v3130_v30, %v6247_v48 }
 0x248   :  { %v3134_v16 = vadd.f32 %v3133_v5, %v3132_v0 }
 0x24a   :  { %5382 = vtanh.f32 %v3134_v16 }
 0x254   :  { %v5383_v37 = vpop.eup %5382 }
 0x255   :  { %v3138_v42 = vmul.f32 %v5383_v37, %v3136_v60 }
 0x257   :  { %3205 = vmatmul.mubr.f32.vlgmr.msra.gmra.mrb[34].mxu0 %v3138_v42  ;;  %3276 = vmatmul.mubr.f32.vlgmr.msra.gmra.mrb[34].mxu1 %v3138_v42 }
 0x258   :  { %4993 = vmatpush1.bf16.msra.mxu0 %v5936_v8  ;;  %5025 = vmatpush1.bf16.msra.mxu1 %v5940_v9 }
 0x259   :  { %4995 = vmatprep.subr.bf16.mxu0 %v5942_v10  ;;  %5027 = vmatprep.subr.bf16.mxu1 %v5954_v14 }
 0x25a   :  { %3390 = vmatprep.mubr.f32.mxu0 %v6738_v18  ;;  %3461 = vmatprep.mubr.f32.mxu1 %v6738_v18 }
 0x25c   :  { %4997 = vmatpush1.bf16.msra.mxu0 %v5974_v20  ;;  %5029 = vmatpush1.bf16.msra.mxu1 %v5978_v21 }
 0x25d   :  { %4999 = vmatprep.subr.bf16.mxu0 %v5980_v22  ;;  %5031 = vmatprep.subr.bf16.mxu1 %v5992_v26 }
 0x260   :  { %5001 = vmatpush1.bf16.msra.mxu0 %v6012_v32  ;;  %5033 = vmatpush1.bf16.msra.mxu1 %v6016_v33 }
 0x261   :  { %5003 = vmatprep.subr.bf16.mxu0 %v6018_v34  ;;  %5035 = vmatprep.subr.bf16.mxu1 %v6030_v38 }
 0x264   :  { %5005 = vmatpush1.bf16.msra.mxu0 %v6048_v44  ;;  %5037 = vmatpush1.bf16.msra.mxu1 %v6052_v45 }
 0x265   :  { %5007 = vmatprep.subr.bf16.mxu0 %v6054_v46  ;;  %5039 = vmatprep.subr.bf16.mxu1 %v6066_v50 }
 0x268   :  { %5009 = vmatpush1.bf16.msra.mxu0 %v6084_v56  ;;  %5041 = vmatpush1.bf16.msra.mxu1 %v6088_v57 }
 0x269   :  { %5011 = vmatprep.subr.bf16.mxu0 %v6090_v58  ;;  %5043 = vmatprep.subr.bf16.mxu1 %v6102_v63 }
 0x26c   :  { %5013 = vmatpush1.bf16.msra.mxu0 %v6120_v7  ;;  %5045 = vmatpush1.bf16.msra.mxu1 %v6124_v11 }
 0x26d   :  { %5015 = vmatprep.subr.bf16.mxu0 %v6126_v12  ;;  %5047 = vmatprep.subr.bf16.mxu1 %v6138_v17 }
 0x270   :  { %5017 = vmatpush1.bf16.msra.mxu0 %v6156_v27  ;;  %5049 = vmatpush1.bf16.msra.mxu1 %v6160_v28 }
 0x271   :  { %5019 = vmatprep.subr.bf16.mxu0 %v6162_v29  ;;  %5051 = vmatprep.subr.bf16.mxu1 %v6171_v35 }
 0x274   :  { %5021 = vmatpush1.bf16.msra.mxu0 %v6180_v39  ;;  %5053 = vmatpush1.bf16.msra.mxu1 %v6184_v40 }
 0x275   :  { %5055 = vmatprep.subr.bf16.mxu0 %v5904_v61  ;;  %5087 = vmatprep.subr.bf16.mxu1 %v5917_v2 }
 0x32a   :  { %v3206_v23 = vpop.f32.mrb[34].mxu0  ;;  %v3277_v48 = vpop.f32.mrb[34].mxu1 }
 0x32b   :  { %v3208_v15 = vpop.f32.mrb[35].mxu0  ;;  %v3279_v52 = vpop.f32.mrb[35].mxu1 }
 0x32c   :  { %v3286_v1 = vcombine.low %v3206_v23, %v3208_v15  ;;  %v3287_v53 = vcombine.low %v3277_v48, %v3279_v52 }
 0x32e   :  { %v3294_v59 = vrot.slane %v3286_v1, %v6218_v6  ;;  %v3301_v3 = vrot.slane %v3287_v53, %v6218_v6 }
 0x330   :  { %v3302_v47 = vcombine.low %v3294_v59, %v3301_v3 }
 0x332   :  { %v3304_v19 = vadd.f32 %v3302_v47, %v6739_v62  ;;  %v6740_v47 = vcombine.low %v6257_v49, %v6260_v36 }
 0x334   :  { %v4495_v43 = vmul.f32 -1.442695, %v3304_v19  ;;  %v3312_v55 = vrot.slane %v3304_v19, 6 }
 0x336   :  { %5384 = vpow2.f32 %v4495_v43 }
 0x340   :  { %v5385_v51 = vpop.eup %5384 }
 0x341   :  { %v3308_v31 = vadd.f32 1.0, %v5385_v51 }
 0x343   :  { %5386 = vrcp.f32 %v3308_v31 }
 0x344   :  { %5388 = vtanh.f32 %v3312_v55 }
 0x34d   :  { %v5387_v30 = vpop.eup %5386 }
 0x34e   :  { %v3316_v25 = vrot.slane %v5387_v30, 2  ;;  %v5389_v5 = vpop.eup %5388  ;;  %v3322_v42 = vrot.slane %v5387_v30, 4 }
 0x34f   :  { %v3319_v0 = vmul.f32 %v5389_v5, %v5387_v30 }
 0x350   :  { %v3318_v60 = vmul.f32 %v3316_v25, %v3134_v16 }
 0x352   :  { %v3320_v37 = vadd.f32 %v3319_v0, %v3318_v60 }
 0x354   :  { %5390 = vtanh.f32 %v3320_v37 }
 0x35e   :  { %v5391_v23 = vpop.eup %5390 }
 0x35f   :  { %v3324_v48 = vmul.f32 %v5391_v23, %v3322_v42 }
 0x361   :  { %3391 = vmatmul.mubr.f32.vlgmr.msra.gmra.mrb[36].mxu0 %v3324_v48  ;;  %3462 = vmatmul.mubr.f32.vlgmr.msra.gmra.mrb[36].mxu1 %v3324_v48 }
 0x362   :  { %5057 = vmatpush1.bf16.msra.mxu0 %v5936_v8  ;;  %5089 = vmatpush1.bf16.msra.mxu1 %v5940_v9 }
 0x363   :  { %5059 = vmatprep.subr.bf16.mxu0 %v5942_v10  ;;  %5091 = vmatprep.subr.bf16.mxu1 %v5954_v14 }
 0x364   :  { %3576 = vmatprep.mubr.f32.mxu0 %v6738_v18  ;;  %3647 = vmatprep.mubr.f32.mxu1 %v6738_v18 }
 0x366   :  { %5061 = vmatpush1.bf16.msra.mxu0 %v5974_v20  ;;  %5093 = vmatpush1.bf16.msra.mxu1 %v5978_v21 }
 0x367   :  { %5063 = vmatprep.subr.bf16.mxu0 %v5980_v22  ;;  %5095 = vmatprep.subr.bf16.mxu1 %v5992_v26 }
 0x36a   :  { %5065 = vmatpush1.bf16.msra.mxu0 %v6012_v32  ;;  %5097 = vmatpush1.bf16.msra.mxu1 %v6016_v33 }
 0x36b   :  { %5067 = vmatprep.subr.bf16.mxu0 %v6018_v34  ;;  %5099 = vmatprep.subr.bf16.mxu1 %v6030_v38 }
 0x36e   :  { %5069 = vmatpush1.bf16.msra.mxu0 %v6048_v44  ;;  %5101 = vmatpush1.bf16.msra.mxu1 %v6052_v45 }
 0x36f   :  { %5071 = vmatprep.subr.bf16.mxu0 %v6054_v46  ;;  %5103 = vmatprep.subr.bf16.mxu1 %v6066_v50 }
 0x372   :  { %5073 = vmatpush1.bf16.msra.mxu0 %v6084_v56  ;;  %5105 = vmatpush1.bf16.msra.mxu1 %v6088_v57 }
 0x373   :  { %5075 = vmatprep.subr.bf16.mxu0 %v6090_v58  ;;  %5107 = vmatprep.subr.bf16.mxu1 %v6102_v63 }
 0x376   :  { %5077 = vmatpush1.bf16.msra.mxu0 %v6120_v7  ;;  %5109 = vmatpush1.bf16.msra.mxu1 %v6124_v11 }
 0x377   :  { %5079 = vmatprep.subr.bf16.mxu0 %v6126_v12  ;;  %5111 = vmatprep.subr.bf16.mxu1 %v6138_v17 }
 0x37a   :  { %5081 = vmatpush1.bf16.msra.mxu0 %v6156_v27  ;;  %5113 = vmatpush1.bf16.msra.mxu1 %v6160_v28 }
 0x37b   :  { %5083 = vmatprep.subr.bf16.mxu0 %v6162_v29  ;;  %5115 = vmatprep.subr.bf16.mxu1 %v6171_v35 }
 0x37e   :  { %5085 = vmatpush1.bf16.msra.mxu0 %v6180_v39  ;;  %5117 = vmatpush1.bf16.msra.mxu1 %v6184_v40 }
 0x37f   :  { %5119 = vmatprep.subr.bf16.mxu0 %v5904_v61  ;;  %5151 = vmatprep.subr.bf16.mxu1 %v5917_v2 }
 0x434   :  { %v3392_v24 = vpop.f32.mrb[36].mxu0  ;;  %v3463_v41 = vpop.f32.mrb[36].mxu1 }
 0x435   :  { %v3394_v16 = vpop.f32.mrb[37].mxu0  ;;  %v3465_v15 = vpop.f32.mrb[37].mxu1 }
 0x436   :  { %v3472_v52 = vcombine.low %v3392_v24, %v3394_v16  ;;  %v3473_v1 = vcombine.low %v3463_v41, %v3465_v15 }
 0x438   :  { %v3480_v53 = vrot.slane %v3472_v52, %v6218_v6  ;;  %v3487_v59 = vrot.slane %v3473_v1, %v6218_v6 }
 0x43a   :  { %v3488_v3 = vcombine.low %v3480_v53, %v3487_v59  ;;  %v6741_v53 = vld [vmem:[#allocation14_spill] sm:$0xff]  ;;  %v6742_v59 = vld [vmem:[#allocation15_spill] sm:$0xff] }
 0x43c   :  { %v3490_v62 = vadd.f32 %v3488_v3, %v6740_v47  ;;  %v6743_v3 = vcombine.low %v6741_v53, %v6742_v59  ;;  %v6745_v53 = vld [vmem:[#allocation17_spill] sm:$0xff] }
 0x43e   :  { %v4496_v19 = vmul.f32 -1.442695, %v3490_v62  ;;  %v3498_v31 = vrot.slane %v3490_v62, 6 }
 0x440   :  { %5392 = vpow2.f32 %v4496_v19 }
 0x44a   :  { %v5393_v43 = vpop.eup %5392 }
 0x44b   :  { %v3494_v51 = vadd.f32 1.0, %v5393_v43 }
 0x44d   :  { %5394 = vrcp.f32 %v3494_v51 }
 0x44e   :  { %5396 = vtanh.f32 %v3498_v31 }
 0x457   :  { %v5395_v55 = vpop.eup %5394 }
 0x458   :  { %v3502_v30 = vrot.slane %v5395_v55, 2  ;;  %v5397_v25 = vpop.eup %5396  ;;  %v3508_v42 = vrot.slane %v5395_v55, 4 }
 0x459   :  { %v3505_v5 = vmul.f32 %v5397_v25, %v5395_v55 }
 0x45a   :  { %v3504_v0 = vmul.f32 %v3502_v30, %v3320_v37 }
 0x45c   :  { %v3506_v60 = vadd.f32 %v3505_v5, %v3504_v0 }
 0x45e   :  { %5398 = vtanh.f32 %v3506_v60 }
 0x468   :  { %v5399_v23 = vpop.eup %5398 }
 0x469   :  { %v3510_v48 = vmul.f32 %v5399_v23, %v3508_v42 }
 0x46b   :  { %3577 = vmatmul.mubr.f32.vlgmr.msra.gmra.mrb[38].mxu0 %v3510_v48  ;;  %3648 = vmatmul.mubr.f32.vlgmr.msra.gmra.mrb[38].mxu1 %v3510_v48 }
 0x46c   :  { %5121 = vmatpush1.bf16.msra.mxu0 %v5936_v8  ;;  %5153 = vmatpush1.bf16.msra.mxu1 %v5940_v9 }
 0x46d   :  { %5123 = vmatprep.subr.bf16.mxu0 %v5942_v10  ;;  %5155 = vmatprep.subr.bf16.mxu1 %v5954_v14 }
 0x46e   :  { %3762 = vmatprep.mubr.f32.mxu0 %v6738_v18  ;;  %3833 = vmatprep.mubr.f32.mxu1 %v6738_v18 }
 0x470   :  { %5125 = vmatpush1.bf16.msra.mxu0 %v5974_v20  ;;  %5157 = vmatpush1.bf16.msra.mxu1 %v5978_v21 }
 0x471   :  { %5127 = vmatprep.subr.bf16.mxu0 %v5980_v22  ;;  %5159 = vmatprep.subr.bf16.mxu1 %v5992_v26 }
 0x474   :  { %5129 = vmatpush1.bf16.msra.mxu0 %v6012_v32  ;;  %5161 = vmatpush1.bf16.msra.mxu1 %v6016_v33 }
 0x475   :  { %5131 = vmatprep.subr.bf16.mxu0 %v6018_v34  ;;  %5163 = vmatprep.subr.bf16.mxu1 %v6030_v38 }
 0x478   :  { %5133 = vmatpush1.bf16.msra.mxu0 %v6048_v44  ;;  %5165 = vmatpush1.bf16.msra.mxu1 %v6052_v45 }
 0x479   :  { %5135 = vmatprep.subr.bf16.mxu0 %v6054_v46  ;;  %5167 = vmatprep.subr.bf16.mxu1 %v6066_v50 }
 0x47c   :  { %5137 = vmatpush1.bf16.msra.mxu0 %v6084_v56  ;;  %5169 = vmatpush1.bf16.msra.mxu1 %v6088_v57 }
 0x47d   :  { %5139 = vmatprep.subr.bf16.mxu0 %v6090_v58  ;;  %5171 = vmatprep.subr.bf16.mxu1 %v6102_v63 }
 0x480   :  { %5141 = vmatpush1.bf16.msra.mxu0 %v6120_v7  ;;  %5173 = vmatpush1.bf16.msra.mxu1 %v6124_v11 }
 0x481   :  { %5143 = vmatprep.subr.bf16.mxu0 %v6126_v12  ;;  %5175 = vmatprep.subr.bf16.mxu1 %v6138_v17 }
 0x484   :  { %5145 = vmatpush1.bf16.msra.mxu0 %v6156_v27  ;;  %5177 = vmatpush1.bf16.msra.mxu1 %v6160_v28 }
 0x485   :  { %5147 = vmatprep.subr.bf16.mxu0 %v6162_v29  ;;  %5179 = vmatprep.subr.bf16.mxu1 %v6171_v35 }
 0x488   :  { %5149 = vmatpush1.bf16.msra.mxu0 %v6180_v39  ;;  %5181 = vmatpush1.bf16.msra.mxu1 %v6184_v40 }
 0x489   :  { %5183 = vmatprep.subr.bf16.mxu0 %v5904_v61  ;;  %5215 = vmatprep.subr.bf16.mxu1 %v5917_v2 }
 0x53e   :  { %v3578_v36 = vpop.f32.mrb[38].mxu0  ;;  %v3649_v49 = vpop.f32.mrb[38].mxu1 }
 0x53f   :  { %v3580_v37 = vpop.f32.mrb[39].mxu0  ;;  %v3651_v24 = vpop.f32.mrb[39].mxu1 }
 0x540   :  { %v3658_v41 = vcombine.low %v3578_v36, %v3580_v37  ;;  %v3659_v16 = vcombine.low %v3649_v49, %v3651_v24 }
 0x542   :  { %v3666_v15 = vrot.slane %v3658_v41, %v6218_v6  ;;  %v3673_v52 = vrot.slane %v3659_v16, %v6218_v6 }
 0x544   :  { %v3674_v1 = vcombine.low %v3666_v15, %v3673_v52 }
 0x546   :  { %v3676_v47 = vadd.f32 %v3674_v1, %v6743_v3  ;;  %v6744_v1 = vld [vmem:[#allocation16_spill] sm:$0xff] }
 0x547   :  { %v6746_v59 = vcombine.low %v6744_v1, %v6745_v53  ;;  %v4277_v1 = vld [vmem:[%s6712_s8 + $0x30] sm:$0xff]  ;;  %v4278_v53 = vld [vmem:[%s6712_s8 + $0x38] sm:$0xff] }
 0x548   :  { %v4497_v62 = vmul.f32 -1.442695, %v3676_v47  ;;  %v3684_v51 = vrot.slane %v3676_v47, 6 }
 0x54a   :  { %5400 = vpow2.f32 %v4497_v62 }
 0x554   :  { %v5401_v19 = vpop.eup %5400 }
 0x555   :  { %v3680_v43 = vadd.f32 1.0, %v5401_v19 }
 0x557   :  { %5402 = vrcp.f32 %v3680_v43 }
 0x558   :  { %5404 = vtanh.f32 %v3684_v51 }
 0x561   :  { %v5403_v31 = vpop.eup %5402 }
 0x562   :  { %v3688_v55 = vrot.slane %v5403_v31, 2  ;;  %v5405_v30 = vpop.eup %5404  ;;  %v3694_v42 = vrot.slane %v5403_v31, 4 }
 0x563   :  { %v3691_v25 = vmul.f32 %v5405_v30, %v5403_v31 }
 0x564   :  { %v3690_v5 = vmul.f32 %v3688_v55, %v3506_v60 }
 0x566   :  { %v3692_v0 = vadd.f32 %v3691_v25, %v3690_v5 }
 0x568   :  { %5406 = vtanh.f32 %v3692_v0 }
 0x572   :  { %v5407_v23 = vpop.eup %5406 }
 0x573   :  { %v3696_v48 = vmul.f32 %v5407_v23, %v3694_v42 }
 0x575   :  { %3763 = vmatmul.mubr.f32.vlgmr.msra.gmra.mrb[40].mxu0 %v3696_v48  ;;  %3834 = vmatmul.mubr.f32.vlgmr.msra.gmra.mrb[40].mxu1 %v3696_v48 }
 0x576   :  { %5185 = vmatpush1.bf16.msra.mxu0 %v5936_v8  ;;  %5217 = vmatpush1.bf16.msra.mxu1 %v5940_v9 }
 0x577   :  { %5187 = vmatprep.subr.bf16.mxu0 %v5942_v10  ;;  %5219 = vmatprep.subr.bf16.mxu1 %v5954_v14 }
 0x578   :  { %3948 = vmatprep.mubr.f32.mxu0 %v6738_v18  ;;  %4019 = vmatprep.mubr.f32.mxu1 %v6738_v18 }
 0x57a   :  { %5189 = vmatpush1.bf16.msra.mxu0 %v5974_v20  ;;  %5221 = vmatpush1.bf16.msra.mxu1 %v5978_v21 }
 0x57b   :  { %5191 = vmatprep.subr.bf16.mxu0 %v5980_v22  ;;  %5223 = vmatprep.subr.bf16.mxu1 %v5992_v26 }
 0x57e   :  { %5193 = vmatpush1.bf16.msra.mxu0 %v6012_v32  ;;  %5225 = vmatpush1.bf16.msra.mxu1 %v6016_v33 }
 0x57f   :  { %5195 = vmatprep.subr.bf16.mxu0 %v6018_v34  ;;  %5227 = vmatprep.subr.bf16.mxu1 %v6030_v38 }
 0x582   :  { %5197 = vmatpush1.bf16.msra.mxu0 %v6048_v44  ;;  %5229 = vmatpush1.bf16.msra.mxu1 %v6052_v45 }
 0x583   :  { %5199 = vmatprep.subr.bf16.mxu0 %v6054_v46  ;;  %5231 = vmatprep.subr.bf16.mxu1 %v6066_v50 }
 0x586   :  { %5201 = vmatpush1.bf16.msra.mxu0 %v6084_v56  ;;  %5233 = vmatpush1.bf16.msra.mxu1 %v6088_v57 }
 0x587   :  { %5203 = vmatprep.subr.bf16.mxu0 %v6090_v58  ;;  %5235 = vmatprep.subr.bf16.mxu1 %v6102_v63 }
 0x58a   :  { %5205 = vmatpush1.bf16.msra.mxu0 %v6120_v7  ;;  %5237 = vmatpush1.bf16.msra.mxu1 %v6124_v11 }
 0x58b   :  { %5207 = vmatprep.subr.bf16.mxu0 %v6126_v12  ;;  %5239 = vmatprep.subr.bf16.mxu1 %v6138_v17 }
 0x58e   :  { %5209 = vmatpush1.bf16.msra.mxu0 %v6156_v27  ;;  %5241 = vmatpush1.bf16.msra.mxu1 %v6160_v28 }
 0x58f   :  { %5211 = vmatprep.subr.bf16.mxu0 %v6162_v29  ;;  %5243 = vmatprep.subr.bf16.mxu1 %v6171_v35 }
 0x592   :  { %5213 = vmatpush1.bf16.msra.mxu0 %v6180_v39  ;;  %5245 = vmatpush1.bf16.msra.mxu1 %v6184_v40 }
 0x593   :  { %5247 = vmatprep.subr.bf16.mxu0 %v5904_v61  ;;  %5279 = vmatprep.subr.bf16.mxu1 %v5917_v2 }
 0x648   :  { %v3764_v60 = vpop.f32.mrb[40].mxu0  ;;  %v3835_v36 = vpop.f32.mrb[40].mxu1 }
 0x649   :  { %v3766_v49 = vpop.f32.mrb[41].mxu0  ;;  %v3837_v37 = vpop.f32.mrb[41].mxu1 }
 0x64a   :  { %v3844_v24 = vcombine.low %v3764_v60, %v3766_v49  ;;  %v3845_v41 = vcombine.low %v3835_v36, %v3837_v37  ;;  %v4273_v36 = vld [vmem:[%s6712_s8 + $0x10] sm:$0xff] }
 0x64c   :  { %v3852_v16 = vrot.slane %v3844_v24, %v6218_v6  ;;  %v3859_v15 = vrot.slane %v3845_v41, %v6218_v6  ;;  %v4275_v24 = vld [vmem:[%s6712_s8 + $0x20] sm:$0xff]  ;;  %v4276_v41 = vld [vmem:[%s6712_s8 + $0x28] sm:$0xff] }
 0x64e   :  { %v3860_v52 = vcombine.low %v3852_v16, %v3859_v15  ;;  %v5317_v16 = vpack.c.bf16 %v4276_v41, %v4275_v24  ;;  %v6750_v24 = vcombine.low %v6344_v54, %v6351_v13 }
 0x650   :  { %v3862_v3 = vadd.f32 %v3860_v52, %v6746_v59 }
 0x652   :  { %v4498_v47 = vmul.f32 -1.442695, %v3862_v3  ;;  %v3870_v2 = vrot.slane %v3862_v3, 6  ;;  %v5320_v3 = vpack.c.bf16 %v4278_v53, %v4277_v1 }
 0x654   :  { %5408 = vpow2.f32 %v4498_v47 }
 0x65e   :  { %v5409_v61 = vpop.eup %5408 }
 0x65f   :  { %v3866_v62 = vadd.f32 1.0, %v5409_v61  ;;  %v4280_v61 = vld [vmem:[%s6712_s8 + $0x48] sm:$0xff] }
 0x661   :  { %5410 = vrcp.f32 %v3866_v62 }
 0x662   :  { %5412 = vtanh.f32 %v3870_v2 }
 0x66b   :  { %v5411_v19 = vpop.eup %5410 }
 0x66c   :  { %v3874_v43 = vrot.slane %v5411_v19, 2  ;;  %v5413_v51 = vpop.eup %5412  ;;  %v3880_v25 = vrot.slane %v5411_v19, 4 }
 0x66d   :  { %v3877_v31 = vmul.f32 %v5413_v51, %v5411_v19  ;;  %v4281_v19 = vld [vmem:[%s6712_s8 + $0x50] sm:$0xff] }
 0x66e   :  { %v3876_v55 = vmul.f32 %v3874_v43, %v3692_v0  ;;  %v4282_v43 = vld [vmem:[%s6712_s8 + $0x58] sm:$0xff] }
 0x66f   :  { %v5326_v51 = vpack.c.bf16 %v4282_v43, %v4281_v19  ;;  %v4501_v19 = vld [vmem:[%s6713_s9] ss:$0 sm:$0xff] }
 0x670   :  { %v6523_v30 = vadd.f32 %v3877_v31, %v3876_v55  ;;  %v4283_v31 = vld [vmem:[%s6712_s8 + $0x60] sm:$0xff]  ;;  %v4284_v55 = vld [vmem:[%s6712_s8 + $0x68] sm:$0xff] }
 0x672   :  { %5414 = vtanh.f32 %v6523_v30 }
 0x67c   :  { %v5415_v5 = vpop.eup %5414 }
 0x67d   :  { %v3882_v42 = vmul.f32 %v5415_v5, %v3880_v25  ;;  %v4285_v25 = vld [vmem:[%s6712_s8 + $0x70] sm:$0xff]  ;;  %v4286_v5 = vld [vmem:[%s6712_s8 + $0x78] sm:$0xff] }
 0x67f   :  { %3949 = vmatmul.mubr.f32.vlgmr.msra.gmra.mrb[42].mxu0 %v3882_v42  ;;  %4020 = vmatmul.mubr.f32.vlgmr.msra.gmra.mrb[42].mxu1 %v3882_v42  ;;  %v5332_v42 = vpack.c.bf16 %v4286_v5, %v4285_v25 }
 0x680   :  { %5249 = vmatpush1.bf16.msra.mxu0 %v5936_v8  ;;  %5281 = vmatpush1.bf16.msra.mxu1 %v5940_v9  ;;  %v5541_v8 = vmov 0.0|0.0  }
 0x681   :  { %5251 = vmatprep.subr.bf16.mxu0 %v5942_v10  ;;  %5283 = vmatprep.subr.bf16.mxu1 %v5954_v14 }
 0x682   :  { %4134 = vmatprep.mubr.f32.mxu0 %v6738_v18  ;;  %4205 = vmatprep.mubr.f32.mxu1 %v6738_v18 }
 0x684   :  { %5253 = vmatpush1.bf16.msra.mxu0 %v5974_v20  ;;  %5285 = vmatpush1.bf16.msra.mxu1 %v5978_v21 }
 0x685   :  { %5255 = vmatprep.subr.bf16.mxu0 %v5980_v22  ;;  %5287 = vmatprep.subr.bf16.mxu1 %v5992_v26 }
 0x688   :  { %5257 = vmatpush1.bf16.msra.mxu0 %v6012_v32  ;;  %5289 = vmatpush1.bf16.msra.mxu1 %v6016_v33 }
 0x689   :  { %5259 = vmatprep.subr.bf16.mxu0 %v6018_v34  ;;  %5291 = vmatprep.subr.bf16.mxu1 %v6030_v38  ;;  %v6747_v34 = vld [vmem:[#allocation18_spill] sm:$0xff]  ;;  %v6748_v38 = vld [vmem:[#allocation19_spill] sm:$0xff] }
 0x68c   :  { %5261 = vmatpush1.bf16.msra.mxu0 %v6048_v44  ;;  %5293 = vmatpush1.bf16.msra.mxu1 %v6052_v45  ;;  %v6749_v44 = vcombine.low %v6747_v34, %v6748_v38  ;;  %v4259_v34 = vld [vmem:[%s6711_s7 + $0x20] sm:$0xff]  ;;  %v4260_v38 = vld [vmem:[%s6711_s7 + $0x28] sm:$0xff] }
 0x68d   :  { %5263 = vmatprep.subr.bf16.mxu0 %v6054_v46  ;;  %5295 = vmatprep.subr.bf16.mxu1 %v6066_v50 }
 0x690   :  { %5265 = vmatpush1.bf16.msra.mxu0 %v6084_v56  ;;  %5297 = vmatpush1.bf16.msra.mxu1 %v6088_v57 }
 0x691   :  { %5267 = vmatprep.subr.bf16.mxu0 %v6090_v58  ;;  %5299 = vmatprep.subr.bf16.mxu1 %v6102_v63  ;;  %v4493_v58 = vmul.f32 -1.442695, %v6359_v4 }
 0x694   :  { %5269 = vmatpush1.bf16.msra.mxu0 %v6120_v7  ;;  %5301 = vmatpush1.bf16.msra.mxu1 %v6124_v11 }
 0x695   :  { %5271 = vmatprep.subr.bf16.mxu0 %v6126_v12  ;;  %5303 = vmatprep.subr.bf16.mxu1 %v6138_v17 }
 0x698   :  { %5273 = vmatpush1.bf16.msra.mxu0 %v6156_v27  ;;  %5305 = vmatpush1.bf16.msra.mxu1 %v6160_v28 }
 0x699   :  { %5275 = vmatprep.subr.bf16.mxu0 %v6162_v29  ;;  %5307 = vmatprep.subr.bf16.mxu1 %v6171_v35  ;;  %v2940_v35 = vrot.slane %v6359_v4, 6  ;;  %v4274_v4 = vld [vmem:[%s6712_s8 + $0x18] sm:$0xff] }
 0x69a   :  { %v5314_v49 = vpack.c.bf16 %v4274_v4, %v4273_v36 }
 0x69c   :  { %5277 = vmatpush1.bf16.msra.mxu0 %v6180_v39  ;;  %5309 = vmatpush1.bf16.msra.mxu1 %v6184_v40  ;;  %v4271_v39 = vld [vmem:[%s6712_s8] sm:$0xff]  ;;  %v4272_v40 = vld [vmem:[%s6712_s8 + $0x8] sm:$0xff] }
 0x69d   :  { %5310 = vmatprep.subr.bf16.mxu0 %v5541_v8  ;;  %5334 = vmatprep.subr.bf16.mxu1 %v5541_v8  ;;  %v5311_v48 = vpack.c.bf16 %v4272_v40, %v4271_v39 }
 0x752   :  { %v3950_v9 = vpop.f32.mrb[42].mxu0  ;;  %v4021_v10 = vpop.f32.mrb[42].mxu1 }
 0x753   :  { %v3952_v14 = vpop.f32.mrb[43].mxu0  ;;  %v4023_v20 = vpop.f32.mrb[43].mxu1 }
 0x754   :  { %v4030_v21 = vcombine.low %v3950_v9, %v3952_v14  ;;  %v4031_v22 = vcombine.low %v4021_v10, %v4023_v20  ;;  %v4255_v20 = vld [vmem:[%s6711_s7] sm:$0xff] }
 0x756   :  { %v4038_v26 = vrot.slane %v4030_v21, %v6218_v6  ;;  %v4045_v32 = vrot.slane %v4031_v22, %v6218_v6  ;;  %v4256_v21 = vld [vmem:[%s6711_s7 + $0x8] sm:$0xff] }
 0x757   :  { %v5335_v22 = vpack.c.bf16 %v4256_v21, %v4255_v20 }
 0x758   :  { %v4046_v33 = vcombine.low %v4038_v26, %v4045_v32  ;;  %v4257_v26 = vld [vmem:[%s6711_s7 + $0x10] sm:$0xff]  ;;  %v4258_v32 = vld [vmem:[%s6711_s7 + $0x18] sm:$0xff] }
 0x75a   :  { %v4048_v45 = vadd.f32 %v4046_v33, %v6749_v44  ;;  %v5338_v33 = vpack.c.bf16 %v4258_v32, %v4257_v26  ;;  %v5341_v44 = vpack.c.bf16 %v4260_v38, %v4259_v34 }
 0x75c   :  { %v4499_v46 = vmul.f32 -1.442695, %v4048_v45  ;;  %v4056_v57 = vrot.slane %v4048_v45, 6  ;;  %v4261_v45 = vld [vmem:[%s6711_s7 + $0x30] sm:$0xff] }
 0x75e   :  { %5416 = vpow2.f32 %v4499_v46  ;;  %v4262_v46 = vld [vmem:[%s6711_s7 + $0x38] sm:$0xff] }
 0x768   :  { %v5417_v50 = vpop.eup %5416 }
 0x769   :  { %v4052_v56 = vadd.f32 1.0, %v5417_v50  ;;  %v5344_v50 = vpack.c.bf16 %v4262_v46, %v4261_v45 }
 0x76b   :  { %5418 = vrcp.f32 %v4052_v56  ;;  %v4263_v56 = vld [vmem:[%s6711_s7 + $0x40] sm:$0xff] }
 0x76c   :  { %5420 = vtanh.f32 %v4056_v57  ;;  %v4264_v57 = vld [vmem:[%s6711_s7 + $0x48] sm:$0xff] }
 0x76d   :  { %5422 = vpow2.f32 %v4493_v58  ;;  %v5347_v58 = vpack.c.bf16 %v4264_v57, %v4263_v56 }
 0x775   :  { %v5419_v63 = vpop.eup %5418 }
 0x776   :  { %v4060_v7 = vrot.slane %v5419_v63, 2  ;;  %v5421_v11 = vpop.eup %5420  ;;  %v4066_v0 = vrot.slane %v5419_v63, 4 }
 0x777   :  { %v4063_v12 = vmul.f32 %v5421_v11, %v5419_v63  ;;  %v5423_v27 = vpop.eup %5422  ;;  %v4265_v63 = vld [vmem:[%s6711_s7 + $0x50] sm:$0xff] }
 0x778   :  { %v4062_v17 = vmul.f32 %v4060_v7, %v6523_v30  ;;  %v2936_v29 = vadd.f32 1.0, %v5423_v27  ;;  %v5329_v30 = vpack.c.bf16 %v4284_v55, %v4283_v31  ;;  %v4266_v7 = vld [vmem:[%s6711_s7 + $0x58] sm:$0xff] }
 0x779   :  { %v5350_v11 = vpack.c.bf16 %v4266_v7, %v4265_v63 }
 0x77a   :  { %v6567_v28 = vadd.f32 %v4063_v12, %v4062_v17  ;;  %v4267_v12 = vld [vmem:[%s6711_s7 + $0x60] sm:$0xff]  ;;  %v4268_v17 = vld [vmem:[%s6711_s7 + $0x68] sm:$0xff] }
 0x77b   :  { %v5353_v27 = vpack.c.bf16 %v4268_v17, %v4267_v12 }
 0x77c   :  { %5424 = vtanh.f32 %v6567_v28 }
 0x77d   :  { %5426 = vrcp.f32 %v2936_v29  ;;  %v4269_v29 = vld [vmem:[%s6711_s7 + $0x70] sm:$0xff] }
 0x77e   :  { %5428 = vtanh.f32 %v2940_v35  ;;  %v4270_v35 = vld [vmem:[%s6711_s7 + $0x78] sm:$0xff] }
 0x77f   :  { %v5356_v39 = vpack.c.bf16 %v4270_v35, %v4269_v29 }
 0x786   :  { %v5425_v23 = vpop.eup %5424 }
 0x787   :  { %v4068_v60 = vmul.f32 %v5425_v23, %v4066_v0  ;;  %v5427_v37 = vpop.eup %5426 }
 0x788   :  { %v2944_v15 = vrot.slane %v5427_v37, 2  ;;  %v5429_v52 = vpop.eup %5428  ;;  %v2950_v9 = vrot.slane %v5427_v37, 4 }
 0x789   :  { %4135 = vmatmul.mubr.f32.vlgmr.msra.gmra.mrb[44].mxu0 %v4068_v60  ;;  %4206 = vmatmul.mubr.f32.vlgmr.msra.gmra.mrb[44].mxu1 %v4068_v60  ;;  %v2947_v59 = vmul.f32 %v5429_v52, %v5427_v37 }
 0x78a   :  { %5312 = vmatpush3.bf16.msra.mxu0 %v5311_v48  ;;  %4568 = vmatprep.mubr.msk.f32.mxu0 %vm5542_vm1, %v6738_v18  ;;  %v2946_v47 = vmul.f32 0.0, %v2944_v15 }
 0x78b   :  { %5313 = vmatprep.subr.bf16.mxu0 %v5541_v8  ;;  %4603 = vmatprep.mubr.msk.f32.mxu1 %vm5542_vm1, %v6738_v18  ;;  %v4279_v18 = vld [vmem:[%s6712_s8 + $0x40] sm:$0xff] }
 0x78c   :  { %v5323_v62 = vpack.c.bf16 %v4280_v61, %v4279_v18  ;;  %v2948_v2 = vadd.f32 %v2947_v59, %v2946_v47  ;;  %5336 = vmatpush3.bf16.msra.mxu1 %v5335_v22 }
 0x78d   :  { %5337 = vmatprep.subr.bf16.mxu1 %v5541_v8 }
 0x78e   :  { %5315 = vmatpush3.bf16.msra.mxu0 %v5314_v49  ;;  %5430 = vtanh.f32 %v2948_v2 }
 0x78f   :  { %5316 = vmatprep.subr.bf16.mxu0 %v5541_v8 }
 0x790   :  { %5339 = vmatpush3.bf16.msra.mxu1 %v5338_v33 }
 0x791   :  { %5340 = vmatprep.subr.bf16.mxu1 %v5541_v8 }
 0x792   :  { %5318 = vmatpush3.bf16.msra.mxu0 %v5317_v16 }
 0x793   :  { %5319 = vmatprep.subr.bf16.mxu0 %v5541_v8 }
 0x794   :  { %5342 = vmatpush3.bf16.msra.mxu1 %v5341_v44 }
 0x795   :  { %5343 = vmatprep.subr.bf16.mxu1 %v5541_v8 }
 0x796   :  { %5321 = vmatpush3.bf16.msra.mxu0 %v5320_v3 }
 0x797   :  { %5322 = vmatprep.subr.bf16.mxu0 %v5541_v8 }
 0x798   :  { %v5431_v10 = vpop.eup %5430  ;;  %5345 = vmatpush3.bf16.msra.mxu1 %v5344_v50 }
 0x799   :  { %v2952_v14 = vmul.f32 %v5431_v10, %v2950_v9  ;;  %5346 = vmatprep.subr.bf16.mxu1 %v5541_v8 }
 0x79a   :  { %5324 = vmatpush3.bf16.msra.mxu0 %v5323_v62 }
 0x79b   :  { %5325 = vmatprep.subr.bf16.mxu0 %v5541_v8 }
 0x79c   :  { %5348 = vmatpush3.bf16.msra.mxu1 %v5347_v58 }
 0x79d   :  { %5349 = vmatprep.subr.bf16.mxu1 %v5541_v8 }
 0x79e   :  { %5327 = vmatpush3.bf16.msra.mxu0 %v5326_v51 }
 0x79f   :  { %5328 = vmatprep.subr.bf16.mxu0 %v5541_v8 }
 0x7a0   :  { %5351 = vmatpush3.bf16.msra.mxu1 %v5350_v11 }
 0x7a1   :  { %5352 = vmatprep.subr.bf16.mxu1 %v5541_v8 }
 0x7a2   :  { %5330 = vmatpush3.bf16.msra.mxu0 %v5329_v30 }
 0x7a3   :  { %5331 = vmatprep.subr.bf16.mxu0 %v5541_v8 }
 0x7a4   :  { %5354 = vmatpush3.bf16.msra.mxu1 %v5353_v27 }
 0x7a5   :  { %5355 = vmatprep.subr.bf16.mxu1 %v5541_v8 }
 0x7a6   :  { %5333 = vmatpush3.bf16.msra.mxu0 %v5332_v42 }
 0x7a8   :  { %5357 = vmatpush3.bf16.msra.mxu1 %v5356_v39 }
 0x7a9   :  { %4569 = vmatmul.mubr.f32.vlgmr.msra.gmra.mrb[46].mxu0 %v2952_v14 }
 0x85c   :  { %v4136_v40 = vpop.f32.mrb[44].mxu0  ;;  %v4207_v0 = vpop.f32.mrb[44].mxu1 }
 0x85d   :  { %v4138_v23 = vpop.f32.mrb[45].mxu0  ;;  %v4209_v48 = vpop.f32.mrb[45].mxu1 }
 0x85e   :  { %v4216_v60 = vcombine.low %v4136_v40, %v4138_v23  ;;  %v4217_v36 = vcombine.low %v4207_v0, %v4209_v48 }
 0x860   :  { %v4224_v4 = vrot.slane %v4216_v60, %v6218_v6  ;;  %v4231_v49 = vrot.slane %v4217_v36, %v6218_v6 }
 0x862   :  { %v4232_v37 = vcombine.low %v4224_v4, %v4231_v49 }
 0x864   :  { %v4234_v41 = vadd.f32 %v4232_v37, %v6750_v24 }
 0x866   :  { %v4500_v16 = vmul.f32 -1.442695, %v4234_v41  ;;  %v4242_v52 = vrot.slane %v4234_v41, 6 }
 0x868   :  { %5432 = vpow2.f32 %v4500_v16 }
 0x872   :  { %v5433_v15 = vpop.eup %5432 }
 0x873   :  { %v4238_v8 = vadd.f32 1.0, %v5433_v15 }
 0x875   :  { %5434 = vrcp.f32 %v4238_v8 }
 0x876   :  { %5436 = vtanh.f32 %v4242_v52 }
 0x87c   :  { %v4353_v1 = vpop.f32.mrb[46].mxu0 }
 0x87d   :  { %v4570_v53 = vpop.f32.mrb[47].mxu0 }
 0x87f   :  { %v5435_v59 = vpop.eup %5434 }
 0x880   :  { %v4246_v3 = vrot.slane %v5435_v59, 2  ;;  %v5437_v47 = vpop.eup %5436  ;;  %v4252_v62 = vrot.slane %v5435_v59, 4 }
 0x881   :  { %v4249_v18 = vmul.f32 %v5437_v47, %v5435_v59 }
 0x882   :  { %v4248_v6 = vmul.f32 %v4246_v3, %v6567_v28 }
 0x884   :  { %v4250_v61 = vadd.f32 %v4249_v18, %v4248_v6 }
 0x886   :  { %5438 = vtanh.f32 %v4250_v61 }
 0x890   :  { %v5439_v54 = vpop.eup %5438 }
 0x891   :  { %v4254_v13 = vmul.f32 %v5439_v54, %v4252_v62 }
 0x893   :  { %4604 = vmatmul.mubr.f32.vlgmr.msra.gmra.mrb[46].mxu1 %v4254_v13 }
 0x966   :  { %v4423_v2 = vpop.f32.mrb[46].mxu1 }
 0x967   :  { %v4424_v43 = vadd.f32 %v4423_v2, %v4353_v1  ;;  %v4605_v51 = vpop.f32.mrb[47].mxu1 }
 0x969   :  { %v4434_v31 = vadd.f32 %v4501_v19, %v4424_v43 }
 0x96b   :  { %4436 = vst.msk [vmem:[#allocation10] sm:$0x3] %vm4435_vm2, %v4434_v31 }
 0x96c   :  { %5517 = shalt.err (!%p5514_p0)
}
 0x96d   :  { %s5518_s23 = scalar_lea.hbm %s6714_s10, 32 }
 0x96e   :  { %p5519_p1 = scmp.ne.s32.totalorder %s6714_s10, %s5518_s23  ;;  %p5522_p2 = scmp.lt.u32.totalorder %s5518_s23, %s6714_s10 }
 0x970   :  { %p5524_p3 = pnand %p5522_p2, %p5519_p1 }
 0x972   :  { %5527 = shalt.err (!%p5524_p3)
}
 0x973   :  { %4446 = dma.vmem_to_hbm [thread:$0]  %s4444_s19, 32, %s6714_s10, [#allocation6]  }
 0x974   :  { %5532 = dma.done.wait [#allocation6], 32  }
 0x975   :  { %5533 = vsyncadd [#allocation6], 4294967264 }
 0x976   :  { %4450 = vsyncpa [#allocation5], 1 }
 0x977   :  { %4451 = vsyncpa [#allocation8], 1 }
 0x978   :  { %4452 = vsyncpa [#allocation6], 1 }

</bundles_post_ra>
